<compile_context>
chip_gen: v6e
topology: v6e:2x2x1
jax: 0.10.0
libtpu: 0.0.40
codegen_flags: <defaults>
</compile_context>

<pallas_src>
import math
from functools import partial

import jax
import jax.numpy as jnp
from jax.experimental import pallas as pl
from jax.experimental.pallas import tpu as pltpu

LN_EPS = 1e-5  # nn.LayerNorm default


# ----------------------------------------------------------------------------
# in-kernel helpers (operate on register values)
# ----------------------------------------------------------------------------
def _layernorm(x, gamma, beta):
    """Single-pass LayerNorm: sum and sum-of-squares, normalization via rsqrt (EUP)."""
    inv_d = 1.0 / x.shape[-1]
    s1 = jnp.sum(x, axis=-1, keepdims=True)
    s2 = jnp.sum(x * x, axis=-1, keepdims=True)
    mu = s1 * inv_d
    var = s2 * inv_d - mu * mu
    return (x - mu) * jax.lax.rsqrt(var + LN_EPS) * gamma + beta


def _shift_prev(a, seg_len):
    """a[t] <- a[t-1] within each length-seg_len segment (zero at segment start)."""
    m, c = a.shape
    rolled = pltpu.roll(a, shift=1, axis=0)                 # XLU sublane rotate
    row = jax.lax.broadcasted_iota(jnp.int32, (m, c), 0)
    return jnp.where((row % seg_len) == 0, 0.0, rolled)


def _shift_next(a, seg_len):
    """a[t] <- a[t+1] within each length-seg_len segment (zero at segment end)."""
    m, c = a.shape
    rolled = pltpu.roll(a, shift=m - 1, axis=0)             # roll by -1
    row = jax.lax.broadcasted_iota(jnp.int32, (m, c), 0)
    return jnp.where((row % seg_len) == seg_len - 1, 0.0, rolled)


def _conv3(x, w_ref, b_ref, seg_len):
    """conv1d(k=3, padding='both') as three accumulating matmuls on rolled views."""
    y = jnp.dot(x, w_ref[1], preferred_element_type=jnp.float32)
    y += jnp.dot(_shift_prev(x, seg_len), w_ref[0], preferred_element_type=jnp.float32)
    y += jnp.dot(_shift_next(x, seg_len), w_ref[2], preferred_element_type=jnp.float32)
    return y + b_ref[...]


# ----------------------------------------------------------------------------
# fused encoder-layer kernel (one batch-group of (block_b * seq_len) rows per step)
# ----------------------------------------------------------------------------
def _encoder_layer_kernel(x_ref, wq_ref, bq_ref, wk_ref, bk_ref, wv_ref, bv_ref,
                          wo_ref, bo_ref, g1_ref, beta1_ref,
                          w1_ref, b1_ref, w2_ref, b2_ref, g2_ref, beta2_ref,
                          out_ref, *, seq_len, block_b):
    x = x_ref[...]                                       # (M, D), M = block_b * seq_len
    nhead = wq_ref.shape[0]

    # ---- QKV projections into head-major stacks (H, M, dh) ------------------
    # Head weights are indexed on the major head axis (no lane slicing); each
    # projection is a full-K (M,D)@(D,dh) matmul.  1/sqrt(dh) is already folded
    # into wq / bq host-side.
    q_l, k_l, v_l = [], [], []
    for h in range(nhead):
        q_l.append(jnp.dot(x, wq_ref[h], preferred_element_type=jnp.float32) + bq_ref[h])
        k_l.append(jnp.dot(x, wk_ref[h], preferred_element_type=jnp.float32) + bk_ref[h])
        v_l.append(jnp.dot(x, wv_ref[h], preferred_element_type=jnp.float32) + bv_ref[h])
    q_heads = jnp.stack(q_l, axis=0)                     # (H, M, dh)
    k_heads = jnp.stack(k_l, axis=0)
    v_heads = jnp.stack(v_l, axis=0)

    # ---- head-batched attention (one softmax pass over all heads) -----------
    wo3 = wo_ref[...]                                    # (H, dh, D)
    attn_rows = []
    for b in range(block_b):                             # static; block_b is small
        if block_b == 1:
            qb, kb, vb = q_heads, k_heads, v_heads
        else:
            lo = b * seq_len                             # sublane-aligned slice
            qb = q_heads[:, lo:lo + seq_len, :]
            kb = k_heads[:, lo:lo + seq_len, :]
            vb = v_heads[:, lo:lo + seq_len, :]
        s = jnp.einsum('htd,hsd->hts', qb, kb, preferred_element_type=jnp.float32)
        s = s - jnp.max(s, axis=-1, keepdims=True)       # stable softmax (all heads at once)
        p = jnp.exp(s)
        p = p * pl.reciprocal(jnp.sum(p, axis=-1, keepdims=True), approx=True)
        ctx = jnp.einsum('hts,hsd->htd', p, vb, preferred_element_type=jnp.float32)
        oh = jnp.einsum('htd,hde->hte', ctx, wo3, preferred_element_type=jnp.float32)
        attn_rows.append(jnp.sum(oh, axis=0))            # fold heads -> (T, D)
    attn = attn_rows[0] if block_b == 1 else jnp.concatenate(attn_rows, axis=0)
    attn = attn + bo_ref[...]                            # output-projection bias

    # ---- residual + LayerNorm1 ----------------------------------------------
    src = _layernorm(x + attn, g1_ref[...], beta1_ref[...])

    # ---- FFN: conv1d(k=3,'both') -> ReLU -> conv1d(k=3,'both') --------------
    hidden = jnp.maximum(_conv3(src, w1_ref, b1_ref, seq_len), 0.0)
    ffn = _conv3(hidden, w2_ref, b2_ref, seq_len)

    # ---- residual + LayerNorm2 ----------------------------------------------
    out_ref[...] = _layernorm(src + ffn, g2_ref[...], beta2_ref[...]).astype(out_ref.dtype)


def encoder_layer(x2, wq3, bq3, wk3, bk3, wv3, bv3, wo3, bo,
                  g1, beta1, w1, b1, w2, b2, g2, beta2, *, seq_len, num_blocks):
    m_total, d_model = x2.shape
    assert m_total % num_blocks == 0
    m_blk = m_total // num_blocks
    assert m_blk % seq_len == 0
    block_b = m_blk // seq_len

    weights = (wq3, bq3, wk3, bk3, wv3, bv3, wo3, bo,
               g1, beta1, w1, b1, w2, b2, g2, beta2)

    def rep(a):  # replicated (weight) block: full array, same tile every grid step
        return pl.BlockSpec(a.shape, lambda g, _nd=a.ndim: (0,) * _nd)

    return pl.pallas_call(
        partial(_encoder_layer_kernel, seq_len=seq_len, block_b=block_b),
        out_shape=jax.ShapeDtypeStruct((m_total, d_model), x2.dtype),
        grid=(num_blocks,),
        in_specs=[pl.BlockSpec((m_blk, d_model), lambda g: (g, 0))]
                 + [rep(a) for a in weights],
        out_specs=pl.BlockSpec((m_blk, d_model), lambda g: (g, 0)),
        compiler_params=pltpu.CompilerParams(
            dimension_semantics=("parallel",),          # shards grid steps across v7x TCs
            vmem_limit_bytes=48 * 1024 * 1024),         # > default scoped limit, < any chip's VMEM
    )(x2, *weights)


# ----------------------------------------------------------------------------
# Full encoder-layer forward (host-side one-time weight packing)
# ----------------------------------------------------------------------------
def transformer_layer_forward(x, p, *, num_blocks=None):
    b, t, d = x.shape
    h = p["nhead"]
    dh = d // h
    scale = 1.0 / math.sqrt(dh)

    def split_heads_in(w):                  # (D, H*dh) -> (H, D, dh), head-major
        return jnp.transpose(w.reshape(d, h, dh), (1, 0, 2))

    wq3 = split_heads_in(p["wq"] * scale)   # 1/sqrt(dh) folded into Q projection
    bq3 = (p["bq"] * scale).reshape(h, 1, dh)
    wk3 = split_heads_in(p["wk"])
    bk3 = p["bk"].reshape(h, 1, dh)
    wv3 = split_heads_in(p["wv"])
    bv3 = p["bv"].reshape(h, 1, dh)
    wo3 = p["wo"].reshape(h, dh, d)         # (H, dh, D): per-head output-proj slab

    if num_blocks is None:
        # 2 parallel grid steps feed both v7x TensorCores; use num_blocks=1 on
        # single-TC v5e/v6e to avoid per-step overhead.
        num_blocks = min(b, 2)

    out2 = encoder_layer(
        x.reshape(b * t, d),
        wq3, bq3, wk3, bk3, wv3, bv3, wo3, p["bo"],
        p["g1"].reshape(1, d), p["beta1"].reshape(1, d),
        p["w1"], p["b1"], p["w2"], p["b2"],
        p["g2"].reshape(1, d), p["beta2"].reshape(1, d),
        seq_len=t, num_blocks=num_blocks)
    return out2.reshape(b, t, d)            # matches (src, None, None)[0]


def init_params(key, d_model, nhead, ff):
    ks = jax.random.split(key, 8)
    n = lambda k, shape: (0.02 * jax.random.normal(k, shape)).astype(jnp.float32)
    return {
        "nhead": nhead,
        # attention linears, stored as (in, out) so y = x @ W + b
        "wq": n(ks[0], (d_model, d_model)), "bq": jnp.zeros((1, d_model), jnp.float32),
        "wk": n(ks[1], (d_model, d_model)), "bk": jnp.zeros((1, d_model), jnp.float32),
        "wv": n(ks[2], (d_model, d_model)), "bv": jnp.zeros((1, d_model), jnp.float32),
        "wo": n(ks[3], (d_model, d_model)), "bo": jnp.zeros((1, d_model), jnp.float32),
        # conv1d weights stored as (K=3, Cin, Cout); tap order [t-1, t, t+1]
        "w1": n(ks[4], (3, d_model, ff)), "b1": jnp.zeros((1, ff), jnp.float32),
        "w2": n(ks[5], (3, ff, d_model)), "b2": jnp.zeros((1, d_model), jnp.float32),
        # LayerNorm affine params
        "g1": jnp.ones((d_model,), jnp.float32), "beta1": jnp.zeros((d_model,), jnp.float32),
        "g2": jnp.ones((d_model,), jnp.float32), "beta2": jnp.zeros((d_model,), jnp.float32),
    }


if __name__ == "__main__":
    # d_model=128 keeps every vreg/store lane-dense; feedforward_ratio=1 -> ff=128.
    B, T, D, NHEAD = 2, 16, 128, 4
    key = jax.random.PRNGKey(0)
    kx, kp = jax.random.split(key)
    x = jax.random.normal(kx, (B, T, D), dtype=jnp.float32)   # query [batch, seq, d_model]
    params = init_params(kp, D, NHEAD, ff=D)

    out = transformer_layer_forward(x, params)
    out = jax.block_until_ready(out)

    assert out.shape == (B, T, D), out.shape
    assert bool(jnp.all(jnp.isfinite(out)))
    print("KERNEL_OK")
</pallas_src>

<mosaic_0001>
module attributes {stable_mosaic.version = 11 : i64} {
  func.func @_encoder_layer_kernel(%arg0: i32, %arg1: memref<16x128xf32, #tpu.memory_space<vmem>>, %arg2: memref<4x128x32xf32, #tpu.memory_space<vmem>>, %arg3: memref<4x1x32xf32, #tpu.memory_space<vmem>>, %arg4: memref<4x128x32xf32, #tpu.memory_space<vmem>>, %arg5: memref<4x1x32xf32, #tpu.memory_space<vmem>>, %arg6: memref<4x128x32xf32, #tpu.memory_space<vmem>>, %arg7: memref<4x1x32xf32, #tpu.memory_space<vmem>>, %arg8: memref<4x32x128xf32, #tpu.memory_space<vmem>>, %arg9: memref<1x128xf32, #tpu.memory_space<vmem>>, %arg10: memref<1x128xf32, #tpu.memory_space<vmem>>, %arg11: memref<1x128xf32, #tpu.memory_space<vmem>>, %arg12: memref<3x128x128xf32, #tpu.memory_space<vmem>>, %arg13: memref<1x128xf32, #tpu.memory_space<vmem>>, %arg14: memref<3x128x128xf32, #tpu.memory_space<vmem>>, %arg15: memref<1x128xf32, #tpu.memory_space<vmem>>, %arg16: memref<1x128xf32, #tpu.memory_space<vmem>>, %arg17: memref<1x128xf32, #tpu.memory_space<vmem>>, %arg18: memref<16x128xf32, #tpu.memory_space<vmem>>) attributes {dimension_semantics = [#tpu.dimension_semantics<parallel>], iteration_bounds = array<i64: 2>, scalar_prefetch = 0 : i64, scratch_operands = 0 : i64, tpu.core_type = #tpu.core_type<tc>, window_params = [{transform_indices = @transform_0, window_bounds = array<i64: 16, 128>}, {pipeline_mode = #tpu.pipeline_mode<synchronous>, transform_indices = @transform_1, window_bounds = array<i64: 4, 128, 32>}, {pipeline_mode = #tpu.pipeline_mode<synchronous>, transform_indices = @transform_2, window_bounds = array<i64: 4, 1, 32>}, {pipeline_mode = #tpu.pipeline_mode<synchronous>, transform_indices = @transform_3, window_bounds = array<i64: 4, 128, 32>}, {pipeline_mode = #tpu.pipeline_mode<synchronous>, transform_indices = @transform_4, window_bounds = array<i64: 4, 1, 32>}, {pipeline_mode = #tpu.pipeline_mode<synchronous>, transform_indices = @transform_5, window_bounds = array<i64: 4, 128, 32>}, {pipeline_mode = #tpu.pipeline_mode<synchronous>, transform_indices = @transform_6, window_bounds = array<i64: 4, 1, 32>}, {pipeline_mode = #tpu.pipeline_mode<synchronous>, transform_indices = @transform_7, window_bounds = array<i64: 4, 32, 128>}, {pipeline_mode = #tpu.pipeline_mode<synchronous>, transform_indices = @transform_8, window_bounds = array<i64: 1, 128>}, {pipeline_mode = #tpu.pipeline_mode<synchronous>, transform_indices = @transform_9, window_bounds = array<i64: 1, 128>}, {pipeline_mode = #tpu.pipeline_mode<synchronous>, transform_indices = @transform_10, window_bounds = array<i64: 1, 128>}, {pipeline_mode = #tpu.pipeline_mode<synchronous>, transform_indices = @transform_11, window_bounds = array<i64: 3, 128, 128>}, {pipeline_mode = #tpu.pipeline_mode<synchronous>, transform_indices = @transform_12, window_bounds = array<i64: 1, 128>}, {pipeline_mode = #tpu.pipeline_mode<synchronous>, transform_indices = @transform_13, window_bounds = array<i64: 3, 128, 128>}, {pipeline_mode = #tpu.pipeline_mode<synchronous>, transform_indices = @transform_14, window_bounds = array<i64: 1, 128>}, {pipeline_mode = #tpu.pipeline_mode<synchronous>, transform_indices = @transform_15, window_bounds = array<i64: 1, 128>}, {pipeline_mode = #tpu.pipeline_mode<synchronous>, transform_indices = @transform_16, window_bounds = array<i64: 1, 128>}, {transform_indices = @transform_17, window_bounds = array<i64: 16, 128>}]} {
    %c0 = arith.constant 0 : index
    %c0_0 = arith.constant 0 : index
    %0 = vector.load %arg1[%c0, %c0_0] : memref<16x128xf32, #tpu.memory_space<vmem>>, vector<16x128xf32>
    %c0_1 = arith.constant 0 : index
    %c0_2 = arith.constant 0 : index
    %c0_3 = arith.constant 0 : index
    %1 = vector.load %arg2[%c0_1, %c0_2, %c0_3] : memref<4x128x32xf32, #tpu.memory_space<vmem>>, vector<1x128x32xf32>
    %2 = vector.shape_cast %1 : vector<1x128x32xf32> to vector<128x32xf32>
    %cst = arith.constant dense<0.000000e+00> : vector<16x32xf32>
    %3 = tpu.matmul %0, %2, %cst {dimension_numbers = #tpu.dot_dimension_numbers<[1], [0], [0], [1], [0, 0, 1, 1], [], []>} : vector<16x128xf32>, vector<128x32xf32>, vector<16x32xf32> -> vector<16x32xf32>
    %c0_4 = arith.constant 0 : index
    %c0_5 = arith.constant 0 : index
    %c0_6 = arith.constant 0 : index
    %4 = vector.load %arg3[%c0_4, %c0_5, %c0_6] : memref<4x1x32xf32, #tpu.memory_space<vmem>>, vector<1x1x32xf32>
    %5 = vector.shape_cast %4 : vector<1x1x32xf32> to vector<1x32xf32>
    %6 = vector.broadcast %5 : vector<1x32xf32> to vector<16x32xf32>
    %7 = arith.addf %3, %6 : vector<16x32xf32>
    %c0_7 = arith.constant 0 : index
    %c0_8 = arith.constant 0 : index
    %c0_9 = arith.constant 0 : index
    %8 = vector.load %arg4[%c0_7, %c0_8, %c0_9] : memref<4x128x32xf32, #tpu.memory_space<vmem>>, vector<1x128x32xf32>
    %9 = vector.shape_cast %8 : vector<1x128x32xf32> to vector<128x32xf32>
    %cst_10 = arith.constant dense<0.000000e+00> : vector<16x32xf32>
    %10 = tpu.matmul %0, %9, %cst_10 {dimension_numbers = #tpu.dot_dimension_numbers<[1], [0], [0], [1], [0, 0, 1, 1], [], []>} : vector<16x128xf32>, vector<128x32xf32>, vector<16x32xf32> -> vector<16x32xf32>
    %c0_11 = arith.constant 0 : index
    %c0_12 = arith.constant 0 : index
    %c0_13 = arith.constant 0 : index
    %11 = vector.load %arg5[%c0_11, %c0_12, %c0_13] : memref<4x1x32xf32, #tpu.memory_space<vmem>>, vector<1x1x32xf32>
    %12 = vector.shape_cast %11 : vector<1x1x32xf32> to vector<1x32xf32>
    %13 = vector.broadcast %12 : vector<1x32xf32> to vector<16x32xf32>
    %14 = arith.addf %10, %13 : vector<16x32xf32>
    %c0_14 = arith.constant 0 : index
    %c0_15 = arith.constant 0 : index
    %c0_16 = arith.constant 0 : index
    %15 = vector.load %arg6[%c0_14, %c0_15, %c0_16] : memref<4x128x32xf32, #tpu.memory_space<vmem>>, vector<1x128x32xf32>
    %16 = vector.shape_cast %15 : vector<1x128x32xf32> to vector<128x32xf32>
    %cst_17 = arith.constant dense<0.000000e+00> : vector<16x32xf32>
    %17 = tpu.matmul %0, %16, %cst_17 {dimension_numbers = #tpu.dot_dimension_numbers<[1], [0], [0], [1], [0, 0, 1, 1], [], []>} : vector<16x128xf32>, vector<128x32xf32>, vector<16x32xf32> -> vector<16x32xf32>
    %c0_18 = arith.constant 0 : index
    %c0_19 = arith.constant 0 : index
    %c0_20 = arith.constant 0 : index
    %18 = vector.load %arg7[%c0_18, %c0_19, %c0_20] : memref<4x1x32xf32, #tpu.memory_space<vmem>>, vector<1x1x32xf32>
    %19 = vector.shape_cast %18 : vector<1x1x32xf32> to vector<1x32xf32>
    %20 = vector.broadcast %19 : vector<1x32xf32> to vector<16x32xf32>
    %21 = arith.addf %17, %20 : vector<16x32xf32>
    %c1 = arith.constant 1 : index
    %c0_21 = arith.constant 0 : index
    %c0_22 = arith.constant 0 : index
    %22 = vector.load %arg2[%c1, %c0_21, %c0_22] : memref<4x128x32xf32, #tpu.memory_space<vmem>>, vector<1x128x32xf32>
    %23 = vector.shape_cast %22 : vector<1x128x32xf32> to vector<128x32xf32>
    %cst_23 = arith.constant dense<0.000000e+00> : vector<16x32xf32>
    %24 = tpu.matmul %0, %23, %cst_23 {dimension_numbers = #tpu.dot_dimension_numbers<[1], [0], [0], [1], [0, 0, 1, 1], [], []>} : vector<16x128xf32>, vector<128x32xf32>, vector<16x32xf32> -> vector<16x32xf32>
    %c1_24 = arith.constant 1 : index
    %c0_25 = arith.constant 0 : index
    %c0_26 = arith.constant 0 : index
    %25 = vector.load %arg3[%c1_24, %c0_25, %c0_26] : memref<4x1x32xf32, #tpu.memory_space<vmem>>, vector<1x1x32xf32>
    %26 = vector.shape_cast %25 : vector<1x1x32xf32> to vector<1x32xf32>
    %27 = vector.broadcast %26 : vector<1x32xf32> to vector<16x32xf32>
    %28 = arith.addf %24, %27 : vector<16x32xf32>
    %c1_27 = arith.constant 1 : index
    %c0_28 = arith.constant 0 : index
    %c0_29 = arith.constant 0 : index
    %29 = vector.load %arg4[%c1_27, %c0_28, %c0_29] : memref<4x128x32xf32, #tpu.memory_space<vmem>>, vector<1x128x32xf32>
    %30 = vector.shape_cast %29 : vector<1x128x32xf32> to vector<128x32xf32>
    %cst_30 = arith.constant dense<0.000000e+00> : vector<16x32xf32>
    %31 = tpu.matmul %0, %30, %cst_30 {dimension_numbers = #tpu.dot_dimension_numbers<[1], [0], [0], [1], [0, 0, 1, 1], [], []>} : vector<16x128xf32>, vector<128x32xf32>, vector<16x32xf32> -> vector<16x32xf32>
    %c1_31 = arith.constant 1 : index
    %c0_32 = arith.constant 0 : index
    %c0_33 = arith.constant 0 : index
    %32 = vector.load %arg5[%c1_31, %c0_32, %c0_33] : memref<4x1x32xf32, #tpu.memory_space<vmem>>, vector<1x1x32xf32>
    %33 = vector.shape_cast %32 : vector<1x1x32xf32> to vector<1x32xf32>
    %34 = vector.broadcast %33 : vector<1x32xf32> to vector<16x32xf32>
    %35 = arith.addf %31, %34 : vector<16x32xf32>
    %c1_34 = arith.constant 1 : index
    %c0_35 = arith.constant 0 : index
    %c0_36 = arith.constant 0 : index
    %36 = vector.load %arg6[%c1_34, %c0_35, %c0_36] : memref<4x128x32xf32, #tpu.memory_space<vmem>>, vector<1x128x32xf32>
    %37 = vector.shape_cast %36 : vector<1x128x32xf32> to vector<128x32xf32>
    %cst_37 = arith.constant dense<0.000000e+00> : vector<16x32xf32>
    %38 = tpu.matmul %0, %37, %cst_37 {dimension_numbers = #tpu.dot_dimension_numbers<[1], [0], [0], [1], [0, 0, 1, 1], [], []>} : vector<16x128xf32>, vector<128x32xf32>, vector<16x32xf32> -> vector<16x32xf32>
    %c1_38 = arith.constant 1 : index
    %c0_39 = arith.constant 0 : index
    %c0_40 = arith.constant 0 : index
    %39 = vector.load %arg7[%c1_38, %c0_39, %c0_40] : memref<4x1x32xf32, #tpu.memory_space<vmem>>, vector<1x1x32xf32>
    %40 = vector.shape_cast %39 : vector<1x1x32xf32> to vector<1x32xf32>
    %41 = vector.broadcast %40 : vector<1x32xf32> to vector<16x32xf32>
    %42 = arith.addf %38, %41 : vector<16x32xf32>
    %c2 = arith.constant 2 : index
    %c0_41 = arith.constant 0 : index
    %c0_42 = arith.constant 0 : index
    %43 = vector.load %arg2[%c2, %c0_41, %c0_42] : memref<4x128x32xf32, #tpu.memory_space<vmem>>, vector<1x128x32xf32>
    %44 = vector.shape_cast %43 : vector<1x128x32xf32> to vector<128x32xf32>
    %cst_43 = arith.constant dense<0.000000e+00> : vector<16x32xf32>
    %45 = tpu.matmul %0, %44, %cst_43 {dimension_numbers = #tpu.dot_dimension_numbers<[1], [0], [0], [1], [0, 0, 1, 1], [], []>} : vector<16x128xf32>, vector<128x32xf32>, vector<16x32xf32> -> vector<16x32xf32>
    %c2_44 = arith.constant 2 : index
    %c0_45 = arith.constant 0 : index
    %c0_46 = arith.constant 0 : index
    %46 = vector.load %arg3[%c2_44, %c0_45, %c0_46] : memref<4x1x32xf32, #tpu.memory_space<vmem>>, vector<1x1x32xf32>
    %47 = vector.shape_cast %46 : vector<1x1x32xf32> to vector<1x32xf32>
    %48 = vector.broadcast %47 : vector<1x32xf32> to vector<16x32xf32>
    %49 = arith.addf %45, %48 : vector<16x32xf32>
    %c2_47 = arith.constant 2 : index
    %c0_48 = arith.constant 0 : index
    %c0_49 = arith.constant 0 : index
    %50 = vector.load %arg4[%c2_47, %c0_48, %c0_49] : memref<4x128x32xf32, #tpu.memory_space<vmem>>, vector<1x128x32xf32>
    %51 = vector.shape_cast %50 : vector<1x128x32xf32> to vector<128x32xf32>
    %cst_50 = arith.constant dense<0.000000e+00> : vector<16x32xf32>
    %52 = tpu.matmul %0, %51, %cst_50 {dimension_numbers = #tpu.dot_dimension_numbers<[1], [0], [0], [1], [0, 0, 1, 1], [], []>} : vector<16x128xf32>, vector<128x32xf32>, vector<16x32xf32> -> vector<16x32xf32>
    %c2_51 = arith.constant 2 : index
    %c0_52 = arith.constant 0 : index
    %c0_53 = arith.constant 0 : index
    %53 = vector.load %arg5[%c2_51, %c0_52, %c0_53] : memref<4x1x32xf32, #tpu.memory_space<vmem>>, vector<1x1x32xf32>
    %54 = vector.shape_cast %53 : vector<1x1x32xf32> to vector<1x32xf32>
    %55 = vector.broadcast %54 : vector<1x32xf32> to vector<16x32xf32>
    %56 = arith.addf %52, %55 : vector<16x32xf32>
    %c2_54 = arith.constant 2 : index
    %c0_55 = arith.constant 0 : index
    %c0_56 = arith.constant 0 : index
    %57 = vector.load %arg6[%c2_54, %c0_55, %c0_56] : memref<4x128x32xf32, #tpu.memory_space<vmem>>, vector<1x128x32xf32>
    %58 = vector.shape_cast %57 : vector<1x128x32xf32> to vector<128x32xf32>
    %cst_57 = arith.constant dense<0.000000e+00> : vector<16x32xf32>
    %59 = tpu.matmul %0, %58, %cst_57 {dimension_numbers = #tpu.dot_dimension_numbers<[1], [0], [0], [1], [0, 0, 1, 1], [], []>} : vector<16x128xf32>, vector<128x32xf32>, vector<16x32xf32> -> vector<16x32xf32>
    %c2_58 = arith.constant 2 : index
    %c0_59 = arith.constant 0 : index
    %c0_60 = arith.constant 0 : index
    %60 = vector.load %arg7[%c2_58, %c0_59, %c0_60] : memref<4x1x32xf32, #tpu.memory_space<vmem>>, vector<1x1x32xf32>
    %61 = vector.shape_cast %60 : vector<1x1x32xf32> to vector<1x32xf32>
    %62 = vector.broadcast %61 : vector<1x32xf32> to vector<16x32xf32>
    %63 = arith.addf %59, %62 : vector<16x32xf32>
    %c3 = arith.constant 3 : index
    %c0_61 = arith.constant 0 : index
    %c0_62 = arith.constant 0 : index
    %64 = vector.load %arg2[%c3, %c0_61, %c0_62] : memref<4x128x32xf32, #tpu.memory_space<vmem>>, vector<1x128x32xf32>
    %65 = vector.shape_cast %64 : vector<1x128x32xf32> to vector<128x32xf32>
    %cst_63 = arith.constant dense<0.000000e+00> : vector<16x32xf32>
    %66 = tpu.matmul %0, %65, %cst_63 {dimension_numbers = #tpu.dot_dimension_numbers<[1], [0], [0], [1], [0, 0, 1, 1], [], []>} : vector<16x128xf32>, vector<128x32xf32>, vector<16x32xf32> -> vector<16x32xf32>
    %c3_64 = arith.constant 3 : index
    %c0_65 = arith.constant 0 : index
    %c0_66 = arith.constant 0 : index
    %67 = vector.load %arg3[%c3_64, %c0_65, %c0_66] : memref<4x1x32xf32, #tpu.memory_space<vmem>>, vector<1x1x32xf32>
    %68 = vector.shape_cast %67 : vector<1x1x32xf32> to vector<1x32xf32>
    %69 = vector.broadcast %68 : vector<1x32xf32> to vector<16x32xf32>
    %70 = arith.addf %66, %69 : vector<16x32xf32>
    %c3_67 = arith.constant 3 : index
    %c0_68 = arith.constant 0 : index
    %c0_69 = arith.constant 0 : index
    %71 = vector.load %arg4[%c3_67, %c0_68, %c0_69] : memref<4x128x32xf32, #tpu.memory_space<vmem>>, vector<1x128x32xf32>
    %72 = vector.shape_cast %71 : vector<1x128x32xf32> to vector<128x32xf32>
    %cst_70 = arith.constant dense<0.000000e+00> : vector<16x32xf32>
    %73 = tpu.matmul %0, %72, %cst_70 {dimension_numbers = #tpu.dot_dimension_numbers<[1], [0], [0], [1], [0, 0, 1, 1], [], []>} : vector<16x128xf32>, vector<128x32xf32>, vector<16x32xf32> -> vector<16x32xf32>
    %c3_71 = arith.constant 3 : index
    %c0_72 = arith.constant 0 : index
    %c0_73 = arith.constant 0 : index
    %74 = vector.load %arg5[%c3_71, %c0_72, %c0_73] : memref<4x1x32xf32, #tpu.memory_space<vmem>>, vector<1x1x32xf32>
    %75 = vector.shape_cast %74 : vector<1x1x32xf32> to vector<1x32xf32>
    %76 = vector.broadcast %75 : vector<1x32xf32> to vector<16x32xf32>
    %77 = arith.addf %73, %76 : vector<16x32xf32>
    %c3_74 = arith.constant 3 : index
    %c0_75 = arith.constant 0 : index
    %c0_76 = arith.constant 0 : index
    %78 = vector.load %arg6[%c3_74, %c0_75, %c0_76] : memref<4x128x32xf32, #tpu.memory_space<vmem>>, vector<1x128x32xf32>
    %79 = vector.shape_cast %78 : vector<1x128x32xf32> to vector<128x32xf32>
    %cst_77 = arith.constant dense<0.000000e+00> : vector<16x32xf32>
    %80 = tpu.matmul %0, %79, %cst_77 {dimension_numbers = #tpu.dot_dimension_numbers<[1], [0], [0], [1], [0, 0, 1, 1], [], []>} : vector<16x128xf32>, vector<128x32xf32>, vector<16x32xf32> -> vector<16x32xf32>
    %c3_78 = arith.constant 3 : index
    %c0_79 = arith.constant 0 : index
    %c0_80 = arith.constant 0 : index
    %81 = vector.load %arg7[%c3_78, %c0_79, %c0_80] : memref<4x1x32xf32, #tpu.memory_space<vmem>>, vector<1x1x32xf32>
    %82 = vector.shape_cast %81 : vector<1x1x32xf32> to vector<1x32xf32>
    %83 = vector.broadcast %82 : vector<1x32xf32> to vector<16x32xf32>
    %84 = arith.addf %80, %83 : vector<16x32xf32>
    %85 = vector.shape_cast %7 : vector<16x32xf32> to vector<1x16x32xf32>
    %86 = vector.shape_cast %28 : vector<16x32xf32> to vector<1x16x32xf32>
    %87 = vector.shape_cast %49 : vector<16x32xf32> to vector<1x16x32xf32>
    %88 = vector.shape_cast %70 : vector<16x32xf32> to vector<1x16x32xf32>
    %89 = tpu.concatenate %85, %86, %87, %88 in 0 : vector<1x16x32xf32>, vector<1x16x32xf32>, vector<1x16x32xf32>, vector<1x16x32xf32> -> vector<4x16x32xf32>
    %90 = vector.shape_cast %14 : vector<16x32xf32> to vector<1x16x32xf32>
    %91 = vector.shape_cast %35 : vector<16x32xf32> to vector<1x16x32xf32>
    %92 = vector.shape_cast %56 : vector<16x32xf32> to vector<1x16x32xf32>
    %93 = vector.shape_cast %77 : vector<16x32xf32> to vector<1x16x32xf32>
    %94 = tpu.concatenate %90, %91, %92, %93 in 0 : vector<1x16x32xf32>, vector<1x16x32xf32>, vector<1x16x32xf32>, vector<1x16x32xf32> -> vector<4x16x32xf32>
    %95 = vector.shape_cast %21 : vector<16x32xf32> to vector<1x16x32xf32>
    %96 = vector.shape_cast %42 : vector<16x32xf32> to vector<1x16x32xf32>
    %97 = vector.shape_cast %63 : vector<16x32xf32> to vector<1x16x32xf32>
    %98 = vector.shape_cast %84 : vector<16x32xf32> to vector<1x16x32xf32>
    %99 = tpu.concatenate %95, %96, %97, %98 in 0 : vector<1x16x32xf32>, vector<1x16x32xf32>, vector<1x16x32xf32>, vector<1x16x32xf32> -> vector<4x16x32xf32>
    %c0_81 = arith.constant 0 : index
    %c0_82 = arith.constant 0 : index
    %c0_83 = arith.constant 0 : index
    %100 = vector.load %arg8[%c0_81, %c0_82, %c0_83] : memref<4x32x128xf32, #tpu.memory_space<vmem>>, vector<4x32x128xf32>
    "tpu.trace_start"() <{level = 10 : i32, message = "htd,hsd->hts"}> : () -> ()
    %cst_84 = arith.constant dense<0.000000e+00> : vector<4x16x16xf32>
    %101 = tpu.matmul %89, %94, %cst_84 {dimension_numbers = #tpu.dot_dimension_numbers<[2], [2], [1], [1], [0, 0, 0, 1, 1, 1], [0], [0]>} : vector<4x16x32xf32>, vector<4x16x32xf32>, vector<4x16x16xf32> -> vector<4x16x16xf32>
    "tpu.trace_stop"() : () -> ()
    %cst_85 = arith.constant dense<0xFF800000> : vector<4x16xf32>
    %102 = vector.multi_reduction <maximumf>, %101, %cst_85 [2] : vector<4x16x16xf32> to vector<4x16xf32>
    %103 = vector.shape_cast %102 : vector<4x16xf32> to vector<4x16x1xf32>
    %104 = vector.broadcast %103 : vector<4x16x1xf32> to vector<4x16x16xf32>
    %105 = arith.subf %101, %104 : vector<4x16x16xf32>
    %106 = math.exp %105 : vector<4x16x16xf32>
    %cst_86 = arith.constant dense<0.000000e+00> : vector<4x16xf32>
    %107 = vector.multi_reduction <add>, %106, %cst_86 [2] : vector<4x16x16xf32> to vector<4x16xf32>
    %108 = vector.shape_cast %107 : vector<4x16xf32> to vector<4x16x1xf32>
    %109 = tpu.reciprocal %108 {approx = true} : vector<4x16x1xf32> -> vector<4x16x1xf32>
    %110 = vector.broadcast %109 : vector<4x16x1xf32> to vector<4x16x16xf32>
    %111 = arith.mulf %106, %110 : vector<4x16x16xf32>
    "tpu.trace_start"() <{level = 10 : i32, message = "hts,hsd->htd"}> : () -> ()
    %cst_87 = arith.constant dense<0.000000e+00> : vector<4x16x32xf32>
    %112 = tpu.matmul %111, %99, %cst_87 {dimension_numbers = #tpu.dot_dimension_numbers<[2], [1], [1], [2], [0, 0, 0, 1, 1, 2], [0], [0]>} : vector<4x16x16xf32>, vector<4x16x32xf32>, vector<4x16x32xf32> -> vector<4x16x32xf32>
    "tpu.trace_stop"() : () -> ()
    "tpu.trace_start"() <{level = 10 : i32, message = "htd,hde->hte"}> : () -> ()
    %cst_88 = arith.constant dense<0.000000e+00> : vector<4x16x128xf32>
    %113 = tpu.matmul %112, %100, %cst_88 {dimension_numbers = #tpu.dot_dimension_numbers<[2], [1], [1], [2], [0, 0, 0, 1, 1, 2], [0], [0]>} : vector<4x16x32xf32>, vector<4x32x128xf32>, vector<4x16x128xf32> -> vector<4x16x128xf32>
    "tpu.trace_stop"() : () -> ()
    %cst_89 = arith.constant dense<0.000000e+00> : vector<16x128xf32>
    %114 = vector.multi_reduction <add>, %113, %cst_89 [0] : vector<4x16x128xf32> to vector<16x128xf32>
    %c0_90 = arith.constant 0 : index
    %c0_91 = arith.constant 0 : index
    %115 = vector.load %arg9[%c0_90, %c0_91] : memref<1x128xf32, #tpu.memory_space<vmem>>, vector<1x128xf32>
    %116 = vector.broadcast %115 : vector<1x128xf32> to vector<16x128xf32>
    %117 = arith.addf %114, %116 : vector<16x128xf32>
    %118 = arith.addf %0, %117 : vector<16x128xf32>
    %c0_92 = arith.constant 0 : index
    %c0_93 = arith.constant 0 : index
    %119 = vector.load %arg10[%c0_92, %c0_93] : memref<1x128xf32, #tpu.memory_space<vmem>>, vector<1x128xf32>
    %c0_94 = arith.constant 0 : index
    %c0_95 = arith.constant 0 : index
    %120 = vector.load %arg11[%c0_94, %c0_95] : memref<1x128xf32, #tpu.memory_space<vmem>>, vector<1x128xf32>
    %cst_96 = arith.constant dense<0.000000e+00> : vector<16xf32>
    %121 = vector.multi_reduction <add>, %118, %cst_96 [1] : vector<16x128xf32> to vector<16xf32>
    %122 = vector.shape_cast %121 : vector<16xf32> to vector<16x1xf32>
    %123 = arith.mulf %118, %118 : vector<16x128xf32>
    %cst_97 = arith.constant dense<0.000000e+00> : vector<16xf32>
    %124 = vector.multi_reduction <add>, %123, %cst_97 [1] : vector<16x128xf32> to vector<16xf32>
    %125 = vector.shape_cast %124 : vector<16xf32> to vector<16x1xf32>
    %cst_98 = arith.constant 7.812500e-03 : f32
    %126 = vector.broadcast %cst_98 : f32 to vector<16x1xf32>
    %127 = arith.mulf %122, %126 : vector<16x1xf32>
    %cst_99 = arith.constant 7.812500e-03 : f32
    %128 = vector.broadcast %cst_99 : f32 to vector<16x1xf32>
    %129 = arith.mulf %125, %128 : vector<16x1xf32>
    %130 = arith.mulf %127, %127 : vector<16x1xf32>
    %131 = arith.subf %129, %130 : vector<16x1xf32>
    %132 = vector.broadcast %127 : vector<16x1xf32> to vector<16x128xf32>
    %133 = arith.subf %118, %132 : vector<16x128xf32>
    %cst_100 = arith.constant 9.99999974E-6 : f32
    %134 = vector.broadcast %cst_100 : f32 to vector<16x1xf32>
    %135 = arith.addf %131, %134 : vector<16x1xf32>
    %136 = math.rsqrt %135 : vector<16x1xf32>
    %137 = vector.broadcast %136 : vector<16x1xf32> to vector<16x128xf32>
    %138 = arith.mulf %133, %137 : vector<16x128xf32>
    %139 = vector.broadcast %119 : vector<1x128xf32> to vector<16x128xf32>
    %140 = arith.mulf %138, %139 : vector<16x128xf32>
    %141 = vector.broadcast %120 : vector<1x128xf32> to vector<16x128xf32>
    %142 = arith.addf %140, %141 : vector<16x128xf32>
    %c1_101 = arith.constant 1 : index
    %c0_102 = arith.constant 0 : index
    %c0_103 = arith.constant 0 : index
    %143 = vector.load %arg12[%c1_101, %c0_102, %c0_103] : memref<3x128x128xf32, #tpu.memory_space<vmem>>, vector<1x128x128xf32>
    %144 = vector.shape_cast %143 : vector<1x128x128xf32> to vector<128x128xf32>
    %cst_104 = arith.constant dense<0.000000e+00> : vector<16x128xf32>
    %145 = tpu.matmul %142, %144, %cst_104 {dimension_numbers = #tpu.dot_dimension_numbers<[1], [0], [0], [1], [0, 0, 1, 1], [], []>} : vector<16x128xf32>, vector<128x128xf32>, vector<16x128xf32> -> vector<16x128xf32>
    %c1_i32 = arith.constant 1 : i32
    %146 = tpu.dynamic_rotate %142 by %c1_i32 dim 0 : vector<16x128xf32>, i32 -> vector<16x128xf32>
    %147 = tpu.iota {dimensions = array<i32: 0>} : vector<16x128xi32>
    %c16_i32 = arith.constant 16 : i32
    %c0_i32 = arith.constant 0 : i32
    %148 = arith.cmpi eq, %c16_i32, %c0_i32 : i32
    %c1_i32_105 = arith.constant 1 : i32
    %149 = arith.select %148, %c1_i32_105, %c16_i32 : i32
    %150 = vector.broadcast %149 : i32 to vector<16x128xi32>
    %151 = arith.remsi %147, %150 : vector<16x128xi32>
    %c0_i32_106 = arith.constant 0 : i32
    %152 = vector.broadcast %c0_i32_106 : i32 to vector<16x128xi32>
    %153 = arith.cmpi ne, %151, %152 : vector<16x128xi32>
    %c0_i32_107 = arith.constant 0 : i32
    %154 = vector.broadcast %c0_i32_107 : i32 to vector<16x128xi32>
    %155 = arith.cmpi slt, %151, %154 : vector<16x128xi32>
    %c0_i32_108 = arith.constant 0 : i32
    %156 = arith.cmpi slt, %149, %c0_i32_108 : i32
    %157 = vector.broadcast %156 : i1 to vector<16x128xi1>
    %158 = vector.broadcast %157 : vector<16x128xi1> to vector<16x128xi1>
    %159 = arith.xori %155, %158 : vector<16x128xi1>
    %160 = arith.andi %159, %153 : vector<16x128xi1>
    %161 = vector.broadcast %149 : i32 to vector<16x128xi32>
    %162 = arith.addi %151, %161 : vector<16x128xi32>
    %163 = arith.select %160, %162, %151 : vector<16x128xi1>, vector<16x128xi32>
    %c0_i32_109 = arith.constant 0 : i32
    %164 = vector.broadcast %c0_i32_109 : i32 to vector<16x128xi32>
    %165 = arith.cmpi eq, %163, %164 : vector<16x128xi32>
    %cst_110 = arith.constant 0.000000e+00 : f32
    %166 = vector.broadcast %cst_110 : f32 to vector<16x128xf32>
    %167 = arith.select %165, %166, %146 : vector<16x128xi1>, vector<16x128xf32>
    %c0_111 = arith.constant 0 : index
    %c0_112 = arith.constant 0 : index
    %c0_113 = arith.constant 0 : index
    %168 = vector.load %arg12[%c0_111, %c0_112, %c0_113] : memref<3x128x128xf32, #tpu.memory_space<vmem>>, vector<1x128x128xf32>
    %169 = vector.shape_cast %168 : vector<1x128x128xf32> to vector<128x128xf32>
    %cst_114 = arith.constant dense<0.000000e+00> : vector<16x128xf32>
    %170 = tpu.matmul %167, %169, %cst_114 {dimension_numbers = #tpu.dot_dimension_numbers<[1], [0], [0], [1], [0, 0, 1, 1], [], []>} : vector<16x128xf32>, vector<128x128xf32>, vector<16x128xf32> -> vector<16x128xf32>
    %171 = arith.addf %145, %170 : vector<16x128xf32>
    %c15_i32 = arith.constant 15 : i32
    %172 = tpu.dynamic_rotate %142 by %c15_i32 dim 0 : vector<16x128xf32>, i32 -> vector<16x128xf32>
    %173 = tpu.iota {dimensions = array<i32: 0>} : vector<16x128xi32>
    %c16_i32_115 = arith.constant 16 : i32
    %c0_i32_116 = arith.constant 0 : i32
    %174 = arith.cmpi eq, %c16_i32_115, %c0_i32_116 : i32
    %c1_i32_117 = arith.constant 1 : i32
    %175 = arith.select %174, %c1_i32_117, %c16_i32_115 : i32
    %176 = vector.broadcast %175 : i32 to vector<16x128xi32>
    %177 = arith.remsi %173, %176 : vector<16x128xi32>
    %c0_i32_118 = arith.constant 0 : i32
    %178 = vector.broadcast %c0_i32_118 : i32 to vector<16x128xi32>
    %179 = arith.cmpi ne, %177, %178 : vector<16x128xi32>
    %c0_i32_119 = arith.constant 0 : i32
    %180 = vector.broadcast %c0_i32_119 : i32 to vector<16x128xi32>
    %181 = arith.cmpi slt, %177, %180 : vector<16x128xi32>
    %c0_i32_120 = arith.constant 0 : i32
    %182 = arith.cmpi slt, %175, %c0_i32_120 : i32
    %183 = vector.broadcast %182 : i1 to vector<16x128xi1>
    %184 = vector.broadcast %183 : vector<16x128xi1> to vector<16x128xi1>
    %185 = arith.xori %181, %184 : vector<16x128xi1>
    %186 = arith.andi %185, %179 : vector<16x128xi1>
    %187 = vector.broadcast %175 : i32 to vector<16x128xi32>
    %188 = arith.addi %177, %187 : vector<16x128xi32>
    %189 = arith.select %186, %188, %177 : vector<16x128xi1>, vector<16x128xi32>
    %c15_i32_121 = arith.constant 15 : i32
    %190 = vector.broadcast %c15_i32_121 : i32 to vector<16x128xi32>
    %191 = arith.cmpi eq, %189, %190 : vector<16x128xi32>
    %cst_122 = arith.constant 0.000000e+00 : f32
    %192 = vector.broadcast %cst_122 : f32 to vector<16x128xf32>
    %193 = arith.select %191, %192, %172 : vector<16x128xi1>, vector<16x128xf32>
    %c2_123 = arith.constant 2 : index
    %c0_124 = arith.constant 0 : index
    %c0_125 = arith.constant 0 : index
    %194 = vector.load %arg12[%c2_123, %c0_124, %c0_125] : memref<3x128x128xf32, #tpu.memory_space<vmem>>, vector<1x128x128xf32>
    %195 = vector.shape_cast %194 : vector<1x128x128xf32> to vector<128x128xf32>
    %cst_126 = arith.constant dense<0.000000e+00> : vector<16x128xf32>
    %196 = tpu.matmul %193, %195, %cst_126 {dimension_numbers = #tpu.dot_dimension_numbers<[1], [0], [0], [1], [0, 0, 1, 1], [], []>} : vector<16x128xf32>, vector<128x128xf32>, vector<16x128xf32> -> vector<16x128xf32>
    %197 = arith.addf %171, %196 : vector<16x128xf32>
    %c0_127 = arith.constant 0 : index
    %c0_128 = arith.constant 0 : index
    %198 = vector.load %arg13[%c0_127, %c0_128] : memref<1x128xf32, #tpu.memory_space<vmem>>, vector<1x128xf32>
    %199 = vector.broadcast %198 : vector<1x128xf32> to vector<16x128xf32>
    %200 = arith.addf %197, %199 : vector<16x128xf32>
    %cst_129 = arith.constant 0.000000e+00 : f32
    %201 = vector.broadcast %cst_129 : f32 to vector<16x128xf32>
    %202 = arith.maximumf %200, %201 : vector<16x128xf32>
    %c1_130 = arith.constant 1 : index
    %c0_131 = arith.constant 0 : index
    %c0_132 = arith.constant 0 : index
    %203 = vector.load %arg14[%c1_130, %c0_131, %c0_132] : memref<3x128x128xf32, #tpu.memory_space<vmem>>, vector<1x128x128xf32>
    %204 = vector.shape_cast %203 : vector<1x128x128xf32> to vector<128x128xf32>
    %cst_133 = arith.constant dense<0.000000e+00> : vector<16x128xf32>
    %205 = tpu.matmul %202, %204, %cst_133 {dimension_numbers = #tpu.dot_dimension_numbers<[1], [0], [0], [1], [0, 0, 1, 1], [], []>} : vector<16x128xf32>, vector<128x128xf32>, vector<16x128xf32> -> vector<16x128xf32>
    %c1_i32_134 = arith.constant 1 : i32
    %206 = tpu.dynamic_rotate %202 by %c1_i32_134 dim 0 : vector<16x128xf32>, i32 -> vector<16x128xf32>
    %207 = tpu.iota {dimensions = array<i32: 0>} : vector<16x128xi32>
    %c16_i32_135 = arith.constant 16 : i32
    %c0_i32_136 = arith.constant 0 : i32
    %208 = arith.cmpi eq, %c16_i32_135, %c0_i32_136 : i32
    %c1_i32_137 = arith.constant 1 : i32
    %209 = arith.select %208, %c1_i32_137, %c16_i32_135 : i32
    %210 = vector.broadcast %209 : i32 to vector<16x128xi32>
    %211 = arith.remsi %207, %210 : vector<16x128xi32>
    %c0_i32_138 = arith.constant 0 : i32
    %212 = vector.broadcast %c0_i32_138 : i32 to vector<16x128xi32>
    %213 = arith.cmpi ne, %211, %212 : vector<16x128xi32>
    %c0_i32_139 = arith.constant 0 : i32
    %214 = vector.broadcast %c0_i32_139 : i32 to vector<16x128xi32>
    %215 = arith.cmpi slt, %211, %214 : vector<16x128xi32>
    %c0_i32_140 = arith.constant 0 : i32
    %216 = arith.cmpi slt, %209, %c0_i32_140 : i32
    %217 = vector.broadcast %216 : i1 to vector<16x128xi1>
    %218 = vector.broadcast %217 : vector<16x128xi1> to vector<16x128xi1>
    %219 = arith.xori %215, %218 : vector<16x128xi1>
    %220 = arith.andi %219, %213 : vector<16x128xi1>
    %221 = vector.broadcast %209 : i32 to vector<16x128xi32>
    %222 = arith.addi %211, %221 : vector<16x128xi32>
    %223 = arith.select %220, %222, %211 : vector<16x128xi1>, vector<16x128xi32>
    %c0_i32_141 = arith.constant 0 : i32
    %224 = vector.broadcast %c0_i32_141 : i32 to vector<16x128xi32>
    %225 = arith.cmpi eq, %223, %224 : vector<16x128xi32>
    %cst_142 = arith.constant 0.000000e+00 : f32
    %226 = vector.broadcast %cst_142 : f32 to vector<16x128xf32>
    %227 = arith.select %225, %226, %206 : vector<16x128xi1>, vector<16x128xf32>
    %c0_143 = arith.constant 0 : index
    %c0_144 = arith.constant 0 : index
    %c0_145 = arith.constant 0 : index
    %228 = vector.load %arg14[%c0_143, %c0_144, %c0_145] : memref<3x128x128xf32, #tpu.memory_space<vmem>>, vector<1x128x128xf32>
    %229 = vector.shape_cast %228 : vector<1x128x128xf32> to vector<128x128xf32>
    %cst_146 = arith.constant dense<0.000000e+00> : vector<16x128xf32>
    %230 = tpu.matmul %227, %229, %cst_146 {dimension_numbers = #tpu.dot_dimension_numbers<[1], [0], [0], [1], [0, 0, 1, 1], [], []>} : vector<16x128xf32>, vector<128x128xf32>, vector<16x128xf32> -> vector<16x128xf32>
    %231 = arith.addf %205, %230 : vector<16x128xf32>
    %c15_i32_147 = arith.constant 15 : i32
    %232 = tpu.dynamic_rotate %202 by %c15_i32_147 dim 0 : vector<16x128xf32>, i32 -> vector<16x128xf32>
    %233 = tpu.iota {dimensions = array<i32: 0>} : vector<16x128xi32>
    %c16_i32_148 = arith.constant 16 : i32
    %c0_i32_149 = arith.constant 0 : i32
    %234 = arith.cmpi eq, %c16_i32_148, %c0_i32_149 : i32
    %c1_i32_150 = arith.constant 1 : i32
    %235 = arith.select %234, %c1_i32_150, %c16_i32_148 : i32
    %236 = vector.broadcast %235 : i32 to vector<16x128xi32>
    %237 = arith.remsi %233, %236 : vector<16x128xi32>
    %c0_i32_151 = arith.constant 0 : i32
    %238 = vector.broadcast %c0_i32_151 : i32 to vector<16x128xi32>
    %239 = arith.cmpi ne, %237, %238 : vector<16x128xi32>
    %c0_i32_152 = arith.constant 0 : i32
    %240 = vector.broadcast %c0_i32_152 : i32 to vector<16x128xi32>
    %241 = arith.cmpi slt, %237, %240 : vector<16x128xi32>
    %c0_i32_153 = arith.constant 0 : i32
    %242 = arith.cmpi slt, %235, %c0_i32_153 : i32
    %243 = vector.broadcast %242 : i1 to vector<16x128xi1>
    %244 = vector.broadcast %243 : vector<16x128xi1> to vector<16x128xi1>
    %245 = arith.xori %241, %244 : vector<16x128xi1>
    %246 = arith.andi %245, %239 : vector<16x128xi1>
    %247 = vector.broadcast %235 : i32 to vector<16x128xi32>
    %248 = arith.addi %237, %247 : vector<16x128xi32>
    %249 = arith.select %246, %248, %237 : vector<16x128xi1>, vector<16x128xi32>
    %c15_i32_154 = arith.constant 15 : i32
    %250 = vector.broadcast %c15_i32_154 : i32 to vector<16x128xi32>
    %251 = arith.cmpi eq, %249, %250 : vector<16x128xi32>
    %cst_155 = arith.constant 0.000000e+00 : f32
    %252 = vector.broadcast %cst_155 : f32 to vector<16x128xf32>
    %253 = arith.select %251, %252, %232 : vector<16x128xi1>, vector<16x128xf32>
    %c2_156 = arith.constant 2 : index
    %c0_157 = arith.constant 0 : index
    %c0_158 = arith.constant 0 : index
    %254 = vector.load %arg14[%c2_156, %c0_157, %c0_158] : memref<3x128x128xf32, #tpu.memory_space<vmem>>, vector<1x128x128xf32>
    %255 = vector.shape_cast %254 : vector<1x128x128xf32> to vector<128x128xf32>
    %cst_159 = arith.constant dense<0.000000e+00> : vector<16x128xf32>
    %256 = tpu.matmul %253, %255, %cst_159 {dimension_numbers = #tpu.dot_dimension_numbers<[1], [0], [0], [1], [0, 0, 1, 1], [], []>} : vector<16x128xf32>, vector<128x128xf32>, vector<16x128xf32> -> vector<16x128xf32>
    %257 = arith.addf %231, %256 : vector<16x128xf32>
    %c0_160 = arith.constant 0 : index
    %c0_161 = arith.constant 0 : index
    %258 = vector.load %arg15[%c0_160, %c0_161] : memref<1x128xf32, #tpu.memory_space<vmem>>, vector<1x128xf32>
    %259 = vector.broadcast %258 : vector<1x128xf32> to vector<16x128xf32>
    %260 = arith.addf %257, %259 : vector<16x128xf32>
    %261 = arith.addf %142, %260 : vector<16x128xf32>
    %c0_162 = arith.constant 0 : index
    %c0_163 = arith.constant 0 : index
    %262 = vector.load %arg16[%c0_162, %c0_163] : memref<1x128xf32, #tpu.memory_space<vmem>>, vector<1x128xf32>
    %c0_164 = arith.constant 0 : index
    %c0_165 = arith.constant 0 : index
    %263 = vector.load %arg17[%c0_164, %c0_165] : memref<1x128xf32, #tpu.memory_space<vmem>>, vector<1x128xf32>
    %cst_166 = arith.constant dense<0.000000e+00> : vector<16xf32>
    %264 = vector.multi_reduction <add>, %261, %cst_166 [1] : vector<16x128xf32> to vector<16xf32>
    %265 = vector.shape_cast %264 : vector<16xf32> to vector<16x1xf32>
    %266 = arith.mulf %261, %261 : vector<16x128xf32>
    %cst_167 = arith.constant dense<0.000000e+00> : vector<16xf32>
    %267 = vector.multi_reduction <add>, %266, %cst_167 [1] : vector<16x128xf32> to vector<16xf32>
    %268 = vector.shape_cast %267 : vector<16xf32> to vector<16x1xf32>
    %cst_168 = arith.constant 7.812500e-03 : f32
    %269 = vector.broadcast %cst_168 : f32 to vector<16x1xf32>
    %270 = arith.mulf %265, %269 : vector<16x1xf32>
    %cst_169 = arith.constant 7.812500e-03 : f32
    %271 = vector.broadcast %cst_169 : f32 to vector<16x1xf32>
    %272 = arith.mulf %268, %271 : vector<16x1xf32>
    %273 = arith.mulf %270, %270 : vector<16x1xf32>
    %274 = arith.subf %272, %273 : vector<16x1xf32>
    %275 = vector.broadcast %270 : vector<16x1xf32> to vector<16x128xf32>
    %276 = arith.subf %261, %275 : vector<16x128xf32>
    %cst_170 = arith.constant 9.99999974E-6 : f32
    %277 = vector.broadcast %cst_170 : f32 to vector<16x1xf32>
    %278 = arith.addf %274, %277 : vector<16x1xf32>
    %279 = math.rsqrt %278 : vector<16x1xf32>
    %280 = vector.broadcast %279 : vector<16x1xf32> to vector<16x128xf32>
    %281 = arith.mulf %276, %280 : vector<16x128xf32>
    %282 = vector.broadcast %262 : vector<1x128xf32> to vector<16x128xf32>
    %283 = arith.mulf %281, %282 : vector<16x128xf32>
    %284 = vector.broadcast %263 : vector<1x128xf32> to vector<16x128xf32>
    %285 = arith.addf %283, %284 : vector<16x128xf32>
    %c0_171 = arith.constant 0 : index
    %c0_172 = arith.constant 0 : index
    %286 = vector.load %arg18[%c0_171, %c0_172] : memref<16x128xf32, #tpu.memory_space<vmem>>, vector<16x128xf32>
    tpu.vector_store %arg18[%c0_171, %c0_172], %285 {strides = array<i32>} : memref<16x128xf32, #tpu.memory_space<vmem>>, vector<16x128xf32>,
    return
  }
  func.func @transform_0(%arg0: i32) -> (i32, i32) {
    %c0_i32 = arith.constant 0 : i32
    %c0_i32_0 = arith.constant 0 : i32
    return %arg0, %c0_i32 : i32, i32
  }
  func.func @transform_1(%arg0: i32) -> (i32, i32, i32) {
    %c0_i32 = arith.constant 0 : i32
    %c0_i32_0 = arith.constant 0 : i32
    %c0_i32_1 = arith.constant 0 : i32
    %c0_i32_2 = arith.constant 0 : i32
    return %c0_i32, %c0_i32_0, %c0_i32_1 : i32, i32, i32
  }
  func.func @transform_2(%arg0: i32) -> (i32, i32, i32) {
    %c0_i32 = arith.constant 0 : i32
    %c0_i32_0 = arith.constant 0 : i32
    %c0_i32_1 = arith.constant 0 : i32
    %c0_i32_2 = arith.constant 0 : i32
    return %c0_i32, %c0_i32_0, %c0_i32_1 : i32, i32, i32
  }
  func.func @transform_3(%arg0: i32) -> (i32, i32, i32) {
    %c0_i32 = arith.constant 0 : i32
    %c0_i32_0 = arith.constant 0 : i32
    %c0_i32_1 = arith.constant 0 : i32
    %c0_i32_2 = arith.constant 0 : i32
    return %c0_i32, %c0_i32_0, %c0_i32_1 : i32, i32, i32
  }
  func.func @transform_4(%arg0: i32) -> (i32, i32, i32) {
    %c0_i32 = arith.constant 0 : i32
    %c0_i32_0 = arith.constant 0 : i32
    %c0_i32_1 = arith.constant 0 : i32
    %c0_i32_2 = arith.constant 0 : i32
    return %c0_i32, %c0_i32_0, %c0_i32_1 : i32, i32, i32
  }
  func.func @transform_5(%arg0: i32) -> (i32, i32, i32) {
    %c0_i32 = arith.constant 0 : i32
    %c0_i32_0 = arith.constant 0 : i32
    %c0_i32_1 = arith.constant 0 : i32
    %c0_i32_2 = arith.constant 0 : i32
    return %c0_i32, %c0_i32_0, %c0_i32_1 : i32, i32, i32
  }
  func.func @transform_6(%arg0: i32) -> (i32, i32, i32) {
    %c0_i32 = arith.constant 0 : i32
    %c0_i32_0 = arith.constant 0 : i32
    %c0_i32_1 = arith.constant 0 : i32
    %c0_i32_2 = arith.constant 0 : i32
    return %c0_i32, %c0_i32_0, %c0_i32_1 : i32, i32, i32
  }
  func.func @transform_7(%arg0: i32) -> (i32, i32, i32) {
    %c0_i32 = arith.constant 0 : i32
    %c0_i32_0 = arith.constant 0 : i32
    %c0_i32_1 = arith.constant 0 : i32
    %c0_i32_2 = arith.constant 0 : i32
    return %c0_i32, %c0_i32_0, %c0_i32_1 : i32, i32, i32
  }
  func.func @transform_8(%arg0: i32) -> (i32, i32) {
    %c0_i32 = arith.constant 0 : i32
    %c0_i32_0 = arith.constant 0 : i32
    %c0_i32_1 = arith.constant 0 : i32
    return %c0_i32, %c0_i32_0 : i32, i32
  }
  func.func @transform_9(%arg0: i32) -> (i32, i32) {
    %c0_i32 = arith.constant 0 : i32
    %c0_i32_0 = arith.constant 0 : i32
    %c0_i32_1 = arith.constant 0 : i32
    return %c0_i32, %c0_i32_0 : i32, i32
  }
  func.func @transform_10(%arg0: i32) -> (i32, i32) {
    %c0_i32 = arith.constant 0 : i32
    %c0_i32_0 = arith.constant 0 : i32
    %c0_i32_1 = arith.constant 0 : i32
    return %c0_i32, %c0_i32_0 : i32, i32
  }
  func.func @transform_11(%arg0: i32) -> (i32, i32, i32) {
    %c0_i32 = arith.constant 0 : i32
    %c0_i32_0 = arith.constant 0 : i32
    %c0_i32_1 = arith.constant 0 : i32
    %c0_i32_2 = arith.constant 0 : i32
    return %c0_i32, %c0_i32_0, %c0_i32_1 : i32, i32, i32
  }
  func.func @transform_12(%arg0: i32) -> (i32, i32) {
    %c0_i32 = arith.constant 0 : i32
    %c0_i32_0 = arith.constant 0 : i32
    %c0_i32_1 = arith.constant 0 : i32
    return %c0_i32, %c0_i32_0 : i32, i32
  }
  func.func @transform_13(%arg0: i32) -> (i32, i32, i32) {
    %c0_i32 = arith.constant 0 : i32
    %c0_i32_0 = arith.constant 0 : i32
    %c0_i32_1 = arith.constant 0 : i32
    %c0_i32_2 = arith.constant 0 : i32
    return %c0_i32, %c0_i32_0, %c0_i32_1 : i32, i32, i32
  }
  func.func @transform_14(%arg0: i32) -> (i32, i32) {
    %c0_i32 = arith.constant 0 : i32
    %c0_i32_0 = arith.constant 0 : i32
    %c0_i32_1 = arith.constant 0 : i32
    return %c0_i32, %c0_i32_0 : i32, i32
  }
  func.func @transform_15(%arg0: i32) -> (i32, i32) {
    %c0_i32 = arith.constant 0 : i32
    %c0_i32_0 = arith.constant 0 : i32
    %c0_i32_1 = arith.constant 0 : i32
    return %c0_i32, %c0_i32_0 : i32, i32
  }
  func.func @transform_16(%arg0: i32) -> (i32, i32) {
    %c0_i32 = arith.constant 0 : i32
    %c0_i32_0 = arith.constant 0 : i32
    %c0_i32_1 = arith.constant 0 : i32
    return %c0_i32, %c0_i32_0 : i32, i32
  }
  func.func @transform_17(%arg0: i32) -> (i32, i32) {
    %c0_i32 = arith.constant 0 : i32
    %c0_i32_0 = arith.constant 0 : i32
    return %arg0, %c0_i32 : i32, i32
  }
}

</mosaic_0001>

<bundles_post_ra>
// kernel: tpu_custom_call.1
= control target key start
LH: loop header
LB: loop body
LE: loop exit
PB: predicated region body
PF: predicated region fallthrough
CT: control target
= control target key end

     0   :  { %s6549_s0 = inlined_call_operand.vmem [shape: f32[32,128], index: 0, kind: input, shape index: {}]   ;;  %s6550_s1 = inlined_call_operand.vmem [shape: f32[4,128,32], index: 1, kind: input, shape index: {}]   ;;  %s6551_s2 = inlined_call_operand.vmem [shape: f32[4,1,32], index: 2, kind: input, shape index: {}]   ;;  %s6552_s3 = inlined_call_operand.vmem [shape: f32[4,128,32], index: 3, kind: input, shape index: {}]   ;;  %s6553_s4 = inlined_call_operand.vmem [shape: f32[4,1,32], index: 4, kind: input, shape index: {}]   ;;  %s6554_s5 = inlined_call_operand.vmem [shape: f32[4,128,32], index: 5, kind: input, shape index: {}]   ;;  %s6555_s6 = inlined_call_operand.vmem [shape: f32[4,1,32], index: 6, kind: input, shape index: {}]   ;;  %s6556_s7 = inlined_call_operand.vmem [shape: f32[4,32,128], index: 7, kind: input, shape index: {}]   ;;  %s6557_s8 = inlined_call_operand.vmem [shape: f32[1,128], index: 8, kind: input, shape index: {}]   ;;  %s6558_s9 = inlined_call_operand.vmem [shape: f32[1,128], index: 9, kind: input, shape index: {}]   ;;  %s6559_s10 = inlined_call_operand.vmem [shape: f32[1,128], index: 10, kind: input, shape index: {}]   ;;  %s6560_s11 = inlined_call_operand.vmem [shape: f32[3,128,128], index: 11, kind: input, shape index: {}]   ;;  %s6561_s12 = inlined_call_operand.vmem [shape: f32[1,128], index: 12, kind: input, shape index: {}]   ;;  %s6562_s13 = inlined_call_operand.vmem [shape: f32[3,128,128], index: 13, kind: input, shape index: {}]   ;;  %s6563_s14 = inlined_call_operand.vmem [shape: f32[1,128], index: 14, kind: input, shape index: {}]   ;;  %s6564_s15 = inlined_call_operand.vmem [shape: f32[1,128], index: 15, kind: input, shape index: {}]   ;;  %s6565_s16 = inlined_call_operand.vmem [shape: f32[1,128], index: 16, kind: input, shape index: {}]   ;;  %s6566_s17 = inlined_call_operand.hbm [shape: f32[32,128], index: 17, kind: output, shape index: {}]  }
   0x1   :  { %6574 = sst [smem:[#allocation11_spill]] %s6549_s0 }
   0x2   :  { %6575 = sst [smem:[#allocation12_spill]] %s6550_s1 }
   0x3   :  { %6576 = sst [smem:[#allocation13_spill]] %s6551_s2 }
   0x4   :  { %22 = vsyncpa [#allocation3], 0 }
   0x5   :  { %24 = vsyncpa [#allocation3 + $0x1], 0  ;;  %s5303_s24 = smov 0   ;;  %s5305_s25 = smov 0  }
   0x6   :  { %s5307_s26 = smov 0   ;;  %s5309_s27 = smov 0  }
   0x7 LB: > { %6577 = sst [smem:[#allocation5_spill]] %s5196_s24  ;;  %s5324_s28 = sadd.s32 4294967295, %s5208_s27   ;;  %s5208_s27 = sphi %s5309_s27, %s6595_s27   ;;  %s5204_s26 = sphi %s5307_s26, %s6597_s26   ;;  %s5200_s25 = sphi %s5305_s25, %s6599_s25   ;;  %s5196_s24 = sphi %s5303_s24, %s6598_s24  }
   0x8   : > { %6578 = sst [smem:[#allocation6_spill]] %s5204_s26  ;;  %s3664_s29 = sadd.s32 4294967294, %s5208_s27  }
   0x9   : > { %6579 = sst [smem:[#allocation7_spill]] %s5208_s27  ;;  %s5328_s0 = sadd.s32 1, %s5208_s27  }
   0xa   : > { %6580 = sst [smem:[#allocation8_spill]] %s5328_s0  ;;  %s399_s30 = sadd.s32 1, %s5204_s26 }
   0xb   : > { %s396_s18 = ssub.s32 %s5208_s27, %s5328_s0  ;;  %p409_p0 = scmp.ne.s32.totalorder %s5204_s26, %s5200_s25 }
   0xc   : > { %p397_p1 = scmp.eq.s32.totalorder %s396_s18, 0  ;;  %p410_p2 = scmp.eq.s32.totalorder %s5324_s28, 1 }
   0xd   : > { %p415_p3 = scmp.ne.s32.totalorder %s5200_s25, %s5196_s24  ;;  %p416_p4 = scmp.eq.s32.totalorder %s3664_s29, 1 }
   0xe   : > { %s5339_s19 = scalar_select %p397_p1, %s5204_s26, %s399_s30  }
   0xf   : > { %p5341_p5 = por %p410_p2, %p409_p0  ;;  %p5345_p6 = por %p416_p4, %p415_p3 }
  0x10   : > { %6581 = sst [smem:[#allocation9_spill]] %s5339_s19  ;;  %p3667_p7 = scmp.ge.s32.totalorder %s5208_s27, 1 }
  0x11   : > { %s6583_s20 = scalar_select %p5345_p6, 1, 0 }
  0x12   : > { %p491_p8 = scmp.lt.s32.totalorder %s5208_s27, 3 }
  0x13   : > { %6584 = sst [smem:[#allocation10_spill]] %s6583_s20 }
  0x14   : > { %p492_p9 = pnand %p3667_p7, %p491_p8 }
  0x15   : > { %s6585_s23 = sld [smem:[#allocation12_spill]] (!%p492_p9)  ;;  %s3669_s19 = sshll.u32 (!%p492_p9), %s5324_s28, 1 }
  0x16   : > { %495 = sbr.rel (%p492_p9) target bundleno = 2161 (0x871), region = 88  ;;  %p544_p10 = scmp.lt.s32.totalorder (!%p492_p9), %s3669_s19, 3 }
  0x17   : > { %s6586_s24 = sld [smem:[#allocation11_spill]] (!%p492_p9)  ;;  %s540_s27 = sand.u32 (!%p492_p9), 1, %s5200_s25  }
  0x18   : > { %s6587_s2 = sld [smem:[#allocation13_spill]] (!%p492_p9)  ;;  %s6509_s18 = scalar_lea.sflag (!%p492_p9), [#allocation3], %s540_s27 }
  0x1b   : > { %v567_v0 = vld [vmem:[%s6585_s23 + $0x78] sm:$0xff]  ;;  %v566_v2 = vld [vmem:[%s6585_s23 + $0x70] sm:$0xff]  ;;  %v565_v4 = vld [vmem:[%s6585_s23 + $0x68] sm:$0xff]  ;;  %s6601_s19 = smov (!%p544_p10, %s3669_s19), 3  ;;  %vm1762_vm0 = vcmask 261120   ;;  %vm2111_vm1 = vcmask 130048  }
  0x1c   : > { %v665_v1 = vld [vmem:[%s6552_s3 + $0x78] sm:$0xff]  ;;  %4335 = vmatprep.subr.mxu0 %v567_v0  ;;  %v664_v3 = vld [vmem:[%s6552_s3 + $0x70] sm:$0xff]  ;;  %v663_v5 = vld [vmem:[%s6552_s3 + $0x68] sm:$0xff]  ;;  %s3670_s0 = sshll.u32 %s6601_s19, 3 }
  0x1d   : > { %4370 = vmatprep.subr.mxu1 %v665_v1  ;;  %4336 = vmatpush3.msra.mxu0 %v567_v0  ;;  %v564_v6 = vld [vmem:[%s6585_s23 + $0x60] sm:$0xff]  ;;  %v563_v8 = vld [vmem:[%s6585_s23 + $0x58] sm:$0xff]  ;;  %v562_v10 = vld [vmem:[%s6585_s23 + $0x50] sm:$0xff]  ;;  %s5445_s20 = scalar_lea.vmem %s6586_s24, %s3670_s0  ;;  %s3952_s24 = sshll.u32 %s5324_s28, 8 }
  0x1e   : > { %4371 = vmatpush3.msra.mxu1 %v665_v1  ;;  %4337 = vmatprep.subr.mxu0 %v566_v2  ;;  %v662_v7 = vld [vmem:[%s6552_s3 + $0x60] sm:$0xff]  ;;  %v661_v9 = vld [vmem:[%s6552_s3 + $0x58] sm:$0xff]  ;;  %v660_v11 = vld [vmem:[%s6552_s3 + $0x50] sm:$0xff]  ;;  %s6505_s0 = scalar_lea.hbm %s6566_s17, %s3952_s24 }
  0x1f   : > { %4372 = vmatprep.subr.mxu1 %v664_v3  ;;  %4338 = vmatpush3.msra.mxu0 %v566_v2  ;;  %v561_v12 = vld [vmem:[%s6585_s23 + $0x48] sm:$0xff]  ;;  %v560_v14 = vld [vmem:[%s6585_s23 + $0x40] sm:$0xff]  ;;  %v559_v16 = vld [vmem:[%s6585_s23 + $0x38] sm:$0xff] }
  0x20   : > { %4373 = vmatpush3.msra.mxu1 %v664_v3  ;;  %4339 = vmatprep.subr.mxu0 %v565_v4  ;;  %v659_v13 = vld [vmem:[%s6552_s3 + $0x48] sm:$0xff]  ;;  %v658_v15 = vld [vmem:[%s6552_s3 + $0x40] sm:$0xff]  ;;  %v657_v17 = vld [vmem:[%s6552_s3 + $0x38] sm:$0xff] }
  0x21   : > { %4374 = vmatprep.subr.mxu1 %v663_v5  ;;  %4340 = vmatpush3.msra.mxu0 %v565_v4  ;;  %v558_v18 = vld [vmem:[%s6585_s23 + $0x30] sm:$0xff]  ;;  %v557_v20 = vld [vmem:[%s6585_s23 + $0x28] sm:$0xff]  ;;  %v556_v22 = vld [vmem:[%s6585_s23 + $0x20] sm:$0xff] }
  0x22   : > { %4375 = vmatpush3.msra.mxu1 %v663_v5  ;;  %4341 = vmatprep.subr.mxu0 %v564_v6  ;;  %v656_v19 = vld [vmem:[%s6552_s3 + $0x30] sm:$0xff]  ;;  %v655_v21 = vld [vmem:[%s6552_s3 + $0x28] sm:$0xff]  ;;  %v654_v23 = vld [vmem:[%s6552_s3 + $0x20] sm:$0xff] }
  0x23   : > { %4376 = vmatprep.subr.mxu1 %v662_v7  ;;  %4342 = vmatpush3.msra.mxu0 %v564_v6  ;;  %v555_v24 = vld [vmem:[%s6585_s23 + $0x18] sm:$0xff]  ;;  %v554_v26 = vld [vmem:[%s6585_s23 + $0x10] sm:$0xff]  ;;  %v553_v28 = vld [vmem:[%s6585_s23 + $0x8] sm:$0xff] }
  0x24   : > { %4377 = vmatpush3.msra.mxu1 %v662_v7  ;;  %4343 = vmatprep.subr.mxu0 %v563_v8  ;;  %v653_v25 = vld [vmem:[%s6552_s3 + $0x18] sm:$0xff]  ;;  %v652_v27 = vld [vmem:[%s6552_s3 + $0x10] sm:$0xff]  ;;  %v651_v29 = vld [vmem:[%s6552_s3 + $0x8] sm:$0xff] }
  0x25   : > { %4378 = vmatprep.subr.mxu1 %v661_v9  ;;  %4344 = vmatpush3.msra.mxu0 %v563_v8  ;;  %v552_v30 = vld [vmem:[%s6585_s23] sm:$0xff]  ;;  %v5457_v33 = vld [vmem:[%s5445_s20 + $0x8] sm:$0xff]  ;;  %v763_v34 = vld [vmem:[%s6554_s5 + $0x78] sm:$0xff] }
  0x26   : > { %4379 = vmatpush3.msra.mxu1 %v661_v9  ;;  %4345 = vmatprep.subr.mxu0 %v562_v10  ;;  %v650_v31 = vld [vmem:[%s6552_s3] sm:$0xff]  ;;  %v3689_v35 = vld [vmem:[%s6585_s23 + $0xf8] sm:$0xff]  ;;  %v762_v36 = vld [vmem:[%s6554_s5 + $0x70] sm:$0xff] }
  0x27   : > { %4380 = vmatprep.subr.mxu1 %v660_v11  ;;  %4346 = vmatpush3.msra.mxu0 %v562_v10  ;;  %v5454_v32 = vld [vmem:[%s5445_s20] sm:$0xff]  ;;  %v3688_v37 = vld [vmem:[%s6585_s23 + $0xf0] sm:$0xff]  ;;  %v761_v38 = vld [vmem:[%s6554_s5 + $0x68] sm:$0xff] }
  0x28   : > { %4381 = vmatpush3.msra.mxu1 %v660_v11  ;;  %4347 = vmatprep.subr.mxu0 %v561_v12  ;;  %v3687_v39 = vld [vmem:[%s6585_s23 + $0xe8] sm:$0xff]  ;;  %v760_v40 = vld [vmem:[%s6554_s5 + $0x60] sm:$0xff]  ;;  %v759_v42 = vld [vmem:[%s6554_s5 + $0x58] sm:$0xff] }
  0x29   : > { %4382 = vmatprep.subr.mxu1 %v659_v13  ;;  %4348 = vmatpush3.msra.mxu0 %v561_v12  ;;  %v3686_v41 = vld [vmem:[%s6585_s23 + $0xe0] sm:$0xff]  ;;  %v3685_v43 = vld [vmem:[%s6585_s23 + $0xd8] sm:$0xff]  ;;  %v758_v44 = vld [vmem:[%s6554_s5 + $0x50] sm:$0xff] }
  0x2a   : > { %4383 = vmatpush3.msra.mxu1 %v659_v13  ;;  %4349 = vmatprep.subr.mxu0 %v560_v14  ;;  %v3684_v45 = vld [vmem:[%s6585_s23 + $0xd0] sm:$0xff]  ;;  %v757_v46 = vld [vmem:[%s6554_s5 + $0x48] sm:$0xff]  ;;  %v756_v48 = vld [vmem:[%s6554_s5 + $0x40] sm:$0xff] }
  0x2b   : > { %4384 = vmatprep.subr.mxu1 %v658_v15  ;;  %4350 = vmatpush3.msra.mxu0 %v560_v14  ;;  %v3683_v47 = vld [vmem:[%s6585_s23 + $0xc8] sm:$0xff]  ;;  %v3682_v49 = vld [vmem:[%s6585_s23 + $0xc0] sm:$0xff]  ;;  %v755_v50 = vld [vmem:[%s6554_s5 + $0x38] sm:$0xff] }
  0x2c   : > { %4385 = vmatpush3.msra.mxu1 %v658_v15  ;;  %4351 = vmatprep.subr.mxu0 %v559_v16  ;;  %v3681_v51 = vld [vmem:[%s6585_s23 + $0xb8] sm:$0xff]  ;;  %v754_v52 = vld [vmem:[%s6554_s5 + $0x30] sm:$0xff]  ;;  %v753_v54 = vld [vmem:[%s6554_s5 + $0x28] sm:$0xff] }
  0x2d   : > { %4386 = vmatprep.subr.mxu1 %v657_v17  ;;  %4352 = vmatpush3.msra.mxu0 %v559_v16  ;;  %v3680_v53 = vld [vmem:[%s6585_s23 + $0xb0] sm:$0xff]  ;;  %v3679_v55 = vld [vmem:[%s6585_s23 + $0xa8] sm:$0xff]  ;;  %v752_v56 = vld [vmem:[%s6554_s5 + $0x20] sm:$0xff] }
  0x2e   : > { %4387 = vmatpush3.msra.mxu1 %v657_v17  ;;  %4353 = vmatprep.subr.mxu0 %v558_v18  ;;  %v3678_v57 = vld [vmem:[%s6585_s23 + $0xa0] sm:$0xff]  ;;  %v751_v58 = vld [vmem:[%s6554_s5 + $0x18] sm:$0xff]  ;;  %v750_v60 = vld [vmem:[%s6554_s5 + $0x10] sm:$0xff] }
  0x2f   : > { %4388 = vmatprep.subr.mxu1 %v656_v19  ;;  %4354 = vmatpush3.msra.mxu0 %v558_v18  ;;  %v3677_v59 = vld [vmem:[%s6585_s23 + $0x98] sm:$0xff]  ;;  %v3676_v61 = vld [vmem:[%s6585_s23 + $0x90] sm:$0xff]  ;;  %v749_v62 = vld [vmem:[%s6554_s5 + $0x8] sm:$0xff] }
  0x30   : > { %4389 = vmatpush3.msra.mxu1 %v656_v19  ;;  %4355 = vmatprep.subr.mxu0 %v557_v20  ;;  %v3675_v63 = vld [vmem:[%s6585_s23 + $0x88] sm:$0xff]  ;;  %v748_v0 = vld [vmem:[%s6554_s5] sm:$0xff]  ;;  %v3707_v2 = vld [vmem:[%s6552_s3 + $0xf8] sm:$0xff] }
  0x31   : > { %4390 = vmatprep.subr.mxu1 %v655_v21  ;;  %4356 = vmatpush3.msra.mxu0 %v557_v20  ;;  %v3674_v1 = vld [vmem:[%s6585_s23 + $0x80] sm:$0xff]  ;;  %v3725_v3 = vld [vmem:[%s6554_s5 + $0xf8] sm:$0xff]  ;;  %v3706_v4 = vld [vmem:[%s6552_s3 + $0xf0] sm:$0xff] }
  0x32   : > { %4391 = vmatpush3.msra.mxu1 %v655_v21  ;;  %4357 = vmatprep.subr.mxu0 %v556_v22  ;;  %v3724_v5 = vld [vmem:[%s6554_s5 + $0xf0] sm:$0xff]  ;;  %v3705_v6 = vld [vmem:[%s6552_s3 + $0xe8] sm:$0xff]  ;;  %v3704_v8 = vld [vmem:[%s6552_s3 + $0xe0] sm:$0xff] }
  0x33   : > { %4392 = vmatprep.subr.mxu1 %v654_v23  ;;  %4358 = vmatpush3.msra.mxu0 %v556_v22  ;;  %v3723_v7 = vld [vmem:[%s6554_s5 + $0xe8] sm:$0xff]  ;;  %v3722_v9 = vld [vmem:[%s6554_s5 + $0xe0] sm:$0xff]  ;;  %v3703_v10 = vld [vmem:[%s6552_s3 + $0xd8] sm:$0xff] }
  0x34   : > { %4393 = vmatpush3.msra.mxu1 %v654_v23  ;;  %4359 = vmatprep.subr.mxu0 %v555_v24  ;;  %v3721_v11 = vld [vmem:[%s6554_s5 + $0xd8] sm:$0xff]  ;;  %v3702_v12 = vld [vmem:[%s6552_s3 + $0xd0] sm:$0xff]  ;;  %v3701_v14 = vld [vmem:[%s6552_s3 + $0xc8] sm:$0xff] }
  0x35   : > { %4394 = vmatprep.subr.mxu1 %v653_v25  ;;  %4360 = vmatpush3.msra.mxu0 %v555_v24  ;;  %v3720_v13 = vld [vmem:[%s6554_s5 + $0xd0] sm:$0xff]  ;;  %v3719_v15 = vld [vmem:[%s6554_s5 + $0xc8] sm:$0xff]  ;;  %v3700_v16 = vld [vmem:[%s6552_s3 + $0xc0] sm:$0xff] }
  0x36   : > { %4395 = vmatpush3.msra.mxu1 %v653_v25  ;;  %4361 = vmatprep.subr.mxu0 %v554_v26  ;;  %v3718_v17 = vld [vmem:[%s6554_s5 + $0xc0] sm:$0xff]  ;;  %v3699_v18 = vld [vmem:[%s6552_s3 + $0xb8] sm:$0xff]  ;;  %v3698_v20 = vld [vmem:[%s6552_s3 + $0xb0] sm:$0xff] }
  0x37   : > { %4396 = vmatprep.subr.mxu1 %v652_v27  ;;  %4362 = vmatpush3.msra.mxu0 %v554_v26  ;;  %v3717_v19 = vld [vmem:[%s6554_s5 + $0xb8] sm:$0xff]  ;;  %v3716_v21 = vld [vmem:[%s6554_s5 + $0xb0] sm:$0xff]  ;;  %v3697_v22 = vld [vmem:[%s6552_s3 + $0xa8] sm:$0xff] }
  0x38   : > { %4397 = vmatpush3.msra.mxu1 %v652_v27  ;;  %4363 = vmatprep.subr.mxu0 %v553_v28  ;;  %v3715_v23 = vld [vmem:[%s6554_s5 + $0xa8] sm:$0xff]  ;;  %v3696_v24 = vld [vmem:[%s6552_s3 + $0xa0] sm:$0xff]  ;;  %v3695_v26 = vld [vmem:[%s6552_s3 + $0x98] sm:$0xff] }
  0x39   : > { %4398 = vmatprep.subr.mxu1 %v651_v29  ;;  %4364 = vmatpush3.msra.mxu0 %v553_v28  ;;  %v3714_v25 = vld [vmem:[%s6554_s5 + $0xa0] sm:$0xff]  ;;  %v3713_v27 = vld [vmem:[%s6554_s5 + $0x98] sm:$0xff]  ;;  %v3694_v28 = vld [vmem:[%s6552_s3 + $0x90] sm:$0xff] }
  0x3a   : > { %4399 = vmatpush3.msra.mxu1 %v651_v29  ;;  %4365 = vmatprep.subr.mxu0 %v552_v30  ;;  %v3712_v29 = vld [vmem:[%s6554_s5 + $0x90] sm:$0xff] }
  0x3b   : > { %4400 = vmatprep.subr.mxu1 %v650_v31  ;;  %4366 = vmatpush3.msra.mxu0 %v552_v30  ;;  %v3693_v30 = vld [vmem:[%s6552_s3 + $0x88] sm:$0xff] }
  0x3c   : > { %4367 = vmatprep.mubr.f32.mxu0 %v5454_v32  ;;  %4401 = vmatpush3.msra.mxu1 %v650_v31  ;;  %v3711_v31 = vld [vmem:[%s6554_s5 + $0x88] sm:$0xff] }
  0x3d   : > { %4402 = vmatprep.mubr.f32.mxu1 %v5454_v32  ;;  %4368 = vmatmul.mubr.f32.vlgmr.msra.gmra.mxu0 %v5457_v33 }
  0x3e   : > { %4403 = vmatmul.mubr.f32.vlgmr.msra.gmra.mxu1 %v5457_v33  ;;  %4405 = vmatprep.subr.mxu0 %v763_v34 }
  0x3f   : > { %4440 = vmatprep.subr.mxu1 %v3689_v35  ;;  %4406 = vmatpush3.msra.mxu0 %v763_v34  ;;  %v3692_v34 = vld [vmem:[%s6552_s3 + $0x80] sm:$0xff] }
  0x40   : > { %4441 = vmatpush3.msra.mxu1 %v3689_v35  ;;  %4407 = vmatprep.subr.mxu0 %v762_v36  ;;  %v3710_v35 = vld [vmem:[%s6554_s5 + $0x80] sm:$0xff] }
  0x41   : > { %4442 = vmatprep.subr.mxu1 %v3688_v37  ;;  %4408 = vmatpush3.msra.mxu0 %v762_v36  ;;  %v3743_v36 = vld [vmem:[%s6585_s23 + $0x178] sm:$0xff] }
  0x42   : > { %4443 = vmatpush3.msra.mxu1 %v3688_v37  ;;  %4409 = vmatprep.subr.mxu0 %v761_v38  ;;  %v3761_v37 = vld [vmem:[%s6552_s3 + $0x178] sm:$0xff] }
  0x43   : > { %4444 = vmatprep.subr.mxu1 %v3687_v39  ;;  %4410 = vmatpush3.msra.mxu0 %v761_v38  ;;  %v3742_v38 = vld [vmem:[%s6585_s23 + $0x170] sm:$0xff] }
  0x44   : > { %4445 = vmatpush3.msra.mxu1 %v3687_v39  ;;  %4411 = vmatprep.subr.mxu0 %v760_v40  ;;  %v3760_v39 = vld [vmem:[%s6552_s3 + $0x170] sm:$0xff] }
  0x45   : > { %4446 = vmatprep.subr.mxu1 %v3686_v41  ;;  %4412 = vmatpush3.msra.mxu0 %v760_v40  ;;  %v3741_v40 = vld [vmem:[%s6585_s23 + $0x168] sm:$0xff] }
  0x46   : > { %4447 = vmatpush3.msra.mxu1 %v3686_v41  ;;  %4413 = vmatprep.subr.mxu0 %v759_v42  ;;  %v3759_v41 = vld [vmem:[%s6552_s3 + $0x168] sm:$0xff] }
  0x47   : > { %4448 = vmatprep.subr.mxu1 %v3685_v43  ;;  %4414 = vmatpush3.msra.mxu0 %v759_v42  ;;  %v3740_v42 = vld [vmem:[%s6585_s23 + $0x160] sm:$0xff] }
  0x48   : > { %4449 = vmatpush3.msra.mxu1 %v3685_v43  ;;  %4415 = vmatprep.subr.mxu0 %v758_v44  ;;  %v3758_v43 = vld [vmem:[%s6552_s3 + $0x160] sm:$0xff] }
  0x49   : > { %4450 = vmatprep.subr.mxu1 %v3684_v45  ;;  %4416 = vmatpush3.msra.mxu0 %v758_v44  ;;  %v3739_v44 = vld [vmem:[%s6585_s23 + $0x158] sm:$0xff] }
  0x4a   : > { %4451 = vmatpush3.msra.mxu1 %v3684_v45  ;;  %4417 = vmatprep.subr.mxu0 %v757_v46  ;;  %v3757_v45 = vld [vmem:[%s6552_s3 + $0x158] sm:$0xff] }
  0x4b   : > { %4452 = vmatprep.subr.mxu1 %v3683_v47  ;;  %4418 = vmatpush3.msra.mxu0 %v757_v46  ;;  %v3738_v46 = vld [vmem:[%s6585_s23 + $0x150] sm:$0xff] }
  0x4c   : > { %4453 = vmatpush3.msra.mxu1 %v3683_v47  ;;  %4419 = vmatprep.subr.mxu0 %v756_v48  ;;  %v3756_v47 = vld [vmem:[%s6552_s3 + $0x150] sm:$0xff] }
  0x4d   : > { %4454 = vmatprep.subr.mxu1 %v3682_v49  ;;  %4420 = vmatpush3.msra.mxu0 %v756_v48  ;;  %v3737_v48 = vld [vmem:[%s6585_s23 + $0x148] sm:$0xff] }
  0x4e   : > { %4455 = vmatpush3.msra.mxu1 %v3682_v49  ;;  %4421 = vmatprep.subr.mxu0 %v755_v50  ;;  %v3755_v49 = vld [vmem:[%s6552_s3 + $0x148] sm:$0xff] }
  0x4f   : > { %4456 = vmatprep.subr.mxu1 %v3681_v51  ;;  %4422 = vmatpush3.msra.mxu0 %v755_v50  ;;  %v3736_v50 = vld [vmem:[%s6585_s23 + $0x140] sm:$0xff] }
  0x50   : > { %4457 = vmatpush3.msra.mxu1 %v3681_v51  ;;  %4423 = vmatprep.subr.mxu0 %v754_v52  ;;  %v3754_v51 = vld [vmem:[%s6552_s3 + $0x140] sm:$0xff] }
  0x51   : > { %4458 = vmatprep.subr.mxu1 %v3680_v53  ;;  %4424 = vmatpush3.msra.mxu0 %v754_v52  ;;  %v3735_v52 = vld [vmem:[%s6585_s23 + $0x138] sm:$0xff] }
  0x52   : > { %4459 = vmatpush3.msra.mxu1 %v3680_v53  ;;  %4425 = vmatprep.subr.mxu0 %v753_v54  ;;  %v3753_v53 = vld [vmem:[%s6552_s3 + $0x138] sm:$0xff] }
  0x53   : > { %4460 = vmatprep.subr.mxu1 %v3679_v55  ;;  %4426 = vmatpush3.msra.mxu0 %v753_v54  ;;  %v3734_v54 = vld [vmem:[%s6585_s23 + $0x130] sm:$0xff] }
  0x54   : > { %4461 = vmatpush3.msra.mxu1 %v3679_v55  ;;  %4427 = vmatprep.subr.mxu0 %v752_v56  ;;  %v3752_v55 = vld [vmem:[%s6552_s3 + $0x130] sm:$0xff] }
  0x55   : > { %4462 = vmatprep.subr.mxu1 %v3678_v57  ;;  %4428 = vmatpush3.msra.mxu0 %v752_v56  ;;  %v3733_v56 = vld [vmem:[%s6585_s23 + $0x128] sm:$0xff] }
  0x56   : > { %4463 = vmatpush3.msra.mxu1 %v3678_v57  ;;  %4429 = vmatprep.subr.mxu0 %v751_v58  ;;  %v3751_v57 = vld [vmem:[%s6552_s3 + $0x128] sm:$0xff] }
  0x57   : > { %4464 = vmatprep.subr.mxu1 %v3677_v59  ;;  %4430 = vmatpush3.msra.mxu0 %v751_v58  ;;  %v3732_v58 = vld [vmem:[%s6585_s23 + $0x120] sm:$0xff] }
  0x58   : > { %4465 = vmatpush3.msra.mxu1 %v3677_v59  ;;  %4431 = vmatprep.subr.mxu0 %v750_v60  ;;  %v3750_v59 = vld [vmem:[%s6552_s3 + $0x120] sm:$0xff] }
  0x59   : > { %4466 = vmatprep.subr.mxu1 %v3676_v61  ;;  %4432 = vmatpush3.msra.mxu0 %v750_v60  ;;  %v3731_v60 = vld [vmem:[%s6585_s23 + $0x118] sm:$0xff] }
  0x5a   : > { %4467 = vmatpush3.msra.mxu1 %v3676_v61  ;;  %4433 = vmatprep.subr.mxu0 %v749_v62  ;;  %v3749_v61 = vld [vmem:[%s6552_s3 + $0x118] sm:$0xff] }
  0x5b   : > { %4468 = vmatprep.subr.mxu1 %v3675_v63  ;;  %4434 = vmatpush3.msra.mxu0 %v749_v62  ;;  %v3730_v62 = vld [vmem:[%s6585_s23 + $0x110] sm:$0xff] }
  0x5c   : > { %4469 = vmatpush3.msra.mxu1 %v3675_v63  ;;  %4435 = vmatprep.subr.mxu0 %v748_v0  ;;  %v3748_v63 = vld [vmem:[%s6552_s3 + $0x110] sm:$0xff] }
  0x5d   : > { %4470 = vmatprep.subr.mxu1 %v3674_v1  ;;  %4436 = vmatpush3.msra.mxu0 %v748_v0  ;;  %v3729_v0 = vld [vmem:[%s6585_s23 + $0x108] sm:$0xff] }
  0x5e   : > { %4437 = vmatprep.mubr.f32.mxu0 %v5454_v32  ;;  %4471 = vmatpush3.msra.mxu1 %v3674_v1  ;;  %v3747_v1 = vld [vmem:[%s6552_s3 + $0x108] sm:$0xff] }
  0x5f   : > { %4438 = vmatmul.mubr.f32.vlgmr.msra.gmra.mxu0 %v5457_v33  ;;  %4472 = vmatprep.mubr.f32.mxu1 %v5454_v32 }
  0x60   : > { %4475 = vmatprep.subr.mxu0 %v3707_v2  ;;  %4510 = vmatprep.subr.mxu1 %v3725_v3 }
  0x61   : > { %4473 = vmatmul.mubr.f32.vlgmr.msra.gmra.mxu1 %v5457_v33  ;;  %4476 = vmatpush3.msra.mxu0 %v3707_v2  ;;  %v3728_v2 = vld [vmem:[%s6585_s23 + $0x100] sm:$0xff] }
  0x62   : > { %4511 = vmatpush3.msra.mxu1 %v3725_v3  ;;  %4477 = vmatprep.subr.mxu0 %v3706_v4  ;;  %v3746_v3 = vld [vmem:[%s6552_s3 + $0x100] sm:$0xff] }
  0x63   : > { %4512 = vmatprep.subr.mxu1 %v3724_v5  ;;  %4478 = vmatpush3.msra.mxu0 %v3706_v4  ;;  %v3779_v4 = vld [vmem:[%s6554_s5 + $0x178] sm:$0xff] }
  0x64   : > { %4513 = vmatpush3.msra.mxu1 %v3724_v5  ;;  %4479 = vmatprep.subr.mxu0 %v3705_v6  ;;  %v3797_v5 = vld [vmem:[%s6585_s23 + $0x1f8] sm:$0xff] }
  0x65   : > { %4514 = vmatprep.subr.mxu1 %v3723_v7  ;;  %4480 = vmatpush3.msra.mxu0 %v3705_v6  ;;  %v3778_v6 = vld [vmem:[%s6554_s5 + $0x170] sm:$0xff] }
  0x66   : > { %4515 = vmatpush3.msra.mxu1 %v3723_v7  ;;  %4481 = vmatprep.subr.mxu0 %v3704_v8  ;;  %v3796_v7 = vld [vmem:[%s6585_s23 + $0x1f0] sm:$0xff] }
  0x67   : > { %4516 = vmatprep.subr.mxu1 %v3722_v9  ;;  %4482 = vmatpush3.msra.mxu0 %v3704_v8  ;;  %v3777_v8 = vld [vmem:[%s6554_s5 + $0x168] sm:$0xff] }
  0x68   : > { %4517 = vmatpush3.msra.mxu1 %v3722_v9  ;;  %4483 = vmatprep.subr.mxu0 %v3703_v10  ;;  %v3795_v9 = vld [vmem:[%s6585_s23 + $0x1e8] sm:$0xff] }
  0x69   : > { %4518 = vmatprep.subr.mxu1 %v3721_v11  ;;  %4484 = vmatpush3.msra.mxu0 %v3703_v10  ;;  %v3776_v10 = vld [vmem:[%s6554_s5 + $0x160] sm:$0xff] }
  0x6a   : > { %4519 = vmatpush3.msra.mxu1 %v3721_v11  ;;  %4485 = vmatprep.subr.mxu0 %v3702_v12  ;;  %v3794_v11 = vld [vmem:[%s6585_s23 + $0x1e0] sm:$0xff] }
  0x6b   : > { %4520 = vmatprep.subr.mxu1 %v3720_v13  ;;  %4486 = vmatpush3.msra.mxu0 %v3702_v12  ;;  %v3775_v12 = vld [vmem:[%s6554_s5 + $0x158] sm:$0xff] }
  0x6c   : > { %4521 = vmatpush3.msra.mxu1 %v3720_v13  ;;  %4487 = vmatprep.subr.mxu0 %v3701_v14  ;;  %v3793_v13 = vld [vmem:[%s6585_s23 + $0x1d8] sm:$0xff] }
  0x6d   : > { %4522 = vmatprep.subr.mxu1 %v3719_v15  ;;  %4488 = vmatpush3.msra.mxu0 %v3701_v14  ;;  %v3774_v14 = vld [vmem:[%s6554_s5 + $0x150] sm:$0xff] }
  0x6e   : > { %4523 = vmatpush3.msra.mxu1 %v3719_v15  ;;  %4489 = vmatprep.subr.mxu0 %v3700_v16  ;;  %v3792_v15 = vld [vmem:[%s6585_s23 + $0x1d0] sm:$0xff] }
  0x6f   : > { %4524 = vmatprep.subr.mxu1 %v3718_v17  ;;  %4490 = vmatpush3.msra.mxu0 %v3700_v16  ;;  %v3773_v16 = vld [vmem:[%s6554_s5 + $0x148] sm:$0xff] }
  0x70   : > { %4525 = vmatpush3.msra.mxu1 %v3718_v17  ;;  %4491 = vmatprep.subr.mxu0 %v3699_v18  ;;  %v3791_v17 = vld [vmem:[%s6585_s23 + $0x1c8] sm:$0xff] }
  0x71   : > { %4526 = vmatprep.subr.mxu1 %v3717_v19  ;;  %4492 = vmatpush3.msra.mxu0 %v3699_v18  ;;  %v3772_v18 = vld [vmem:[%s6554_s5 + $0x140] sm:$0xff] }
  0x72   : > { %4527 = vmatpush3.msra.mxu1 %v3717_v19  ;;  %4493 = vmatprep.subr.mxu0 %v3698_v20  ;;  %v3790_v19 = vld [vmem:[%s6585_s23 + $0x1c0] sm:$0xff] }
  0x73   : > { %4528 = vmatprep.subr.mxu1 %v3716_v21  ;;  %4494 = vmatpush3.msra.mxu0 %v3698_v20  ;;  %v3771_v20 = vld [vmem:[%s6554_s5 + $0x138] sm:$0xff] }
  0x74   : > { %4529 = vmatpush3.msra.mxu1 %v3716_v21  ;;  %4495 = vmatprep.subr.mxu0 %v3697_v22  ;;  %v3789_v21 = vld [vmem:[%s6585_s23 + $0x1b8] sm:$0xff] }
  0x75   : > { %4530 = vmatprep.subr.mxu1 %v3715_v23  ;;  %4496 = vmatpush3.msra.mxu0 %v3697_v22  ;;  %v3770_v22 = vld [vmem:[%s6554_s5 + $0x130] sm:$0xff] }
  0x76   : > { %4531 = vmatpush3.msra.mxu1 %v3715_v23  ;;  %4497 = vmatprep.subr.mxu0 %v3696_v24  ;;  %v3788_v23 = vld [vmem:[%s6585_s23 + $0x1b0] sm:$0xff] }
  0x77   : > { %4532 = vmatprep.subr.mxu1 %v3714_v25  ;;  %4498 = vmatpush3.msra.mxu0 %v3696_v24  ;;  %v3769_v24 = vld [vmem:[%s6554_s5 + $0x128] sm:$0xff] }
  0x78   : > { %4533 = vmatpush3.msra.mxu1 %v3714_v25  ;;  %4499 = vmatprep.subr.mxu0 %v3695_v26  ;;  %v3787_v25 = vld [vmem:[%s6585_s23 + $0x1a8] sm:$0xff] }
  0x79   : > { %4534 = vmatprep.subr.mxu1 %v3713_v27  ;;  %4500 = vmatpush3.msra.mxu0 %v3695_v26  ;;  %v3768_v26 = vld [vmem:[%s6554_s5 + $0x120] sm:$0xff] }
  0x7a   : > { %4535 = vmatpush3.msra.mxu1 %v3713_v27  ;;  %4501 = vmatprep.subr.mxu0 %v3694_v28  ;;  %v3786_v27 = vld [vmem:[%s6585_s23 + $0x1a0] sm:$0xff] }
  0x7b   : > { %4536 = vmatprep.subr.mxu1 %v3712_v29  ;;  %4502 = vmatpush3.msra.mxu0 %v3694_v28  ;;  %v3767_v28 = vld [vmem:[%s6554_s5 + $0x118] sm:$0xff] }
  0x7c   : > { %4537 = vmatpush3.msra.mxu1 %v3712_v29  ;;  %4503 = vmatprep.subr.mxu0 %v3693_v30  ;;  %v3785_v29 = vld [vmem:[%s6585_s23 + $0x198] sm:$0xff] }
  0x7d   : > { %4538 = vmatprep.subr.mxu1 %v3711_v31  ;;  %4504 = vmatpush3.msra.mxu0 %v3693_v30  ;;  %v3766_v30 = vld [vmem:[%s6554_s5 + $0x110] sm:$0xff] }
  0x7e   : > { %4539 = vmatpush3.msra.mxu1 %v3711_v31  ;;  %4505 = vmatprep.subr.mxu0 %v3692_v34  ;;  %v3784_v31 = vld [vmem:[%s6585_s23 + $0x190] sm:$0xff] }
  0x7f   : > { %4540 = vmatprep.subr.mxu1 %v3710_v35  ;;  %4506 = vmatpush3.msra.mxu0 %v3692_v34  ;;  %v3765_v34 = vld [vmem:[%s6554_s5 + $0x108] sm:$0xff] }
  0x80   : > { %4507 = vmatprep.mubr.f32.mxu0 %v5454_v32  ;;  %4541 = vmatpush3.msra.mxu1 %v3710_v35  ;;  %v3783_v35 = vld [vmem:[%s6585_s23 + $0x188] sm:$0xff] }
  0x81   : > { %4508 = vmatmul.mubr.f32.vlgmr.msra.gmra.mxu0 %v5457_v33  ;;  %4542 = vmatprep.mubr.f32.mxu1 %v5454_v32 }
  0x82   : > { %4545 = vmatprep.subr.mxu0 %v3743_v36  ;;  %4580 = vmatprep.subr.mxu1 %v3761_v37 }
  0x83   : > { %4543 = vmatmul.mubr.f32.vlgmr.msra.gmra.mxu1 %v5457_v33  ;;  %4546 = vmatpush3.msra.mxu0 %v3743_v36  ;;  %v3764_v36 = vld [vmem:[%s6554_s5 + $0x100] sm:$0xff] }
  0x84   : > { %4581 = vmatpush3.msra.mxu1 %v3761_v37  ;;  %4547 = vmatprep.subr.mxu0 %v3742_v38  ;;  %v3782_v37 = vld [vmem:[%s6585_s23 + $0x180] sm:$0xff] }
  0x85   : > { %4582 = vmatprep.subr.mxu1 %v3760_v39  ;;  %4548 = vmatpush3.msra.mxu0 %v3742_v38  ;;  %v3815_v38 = vld [vmem:[%s6552_s3 + $0x1f8] sm:$0xff] }
  0x86   : > { %4583 = vmatpush3.msra.mxu1 %v3760_v39  ;;  %4549 = vmatprep.subr.mxu0 %v3741_v40  ;;  %v3814_v39 = vld [vmem:[%s6552_s3 + $0x1f0] sm:$0xff] }
  0x87   : > { %4584 = vmatprep.subr.mxu1 %v3759_v41  ;;  %4550 = vmatpush3.msra.mxu0 %v3741_v40  ;;  %v3813_v40 = vld [vmem:[%s6552_s3 + $0x1e8] sm:$0xff] }
  0x88   : > { %4585 = vmatpush3.msra.mxu1 %v3759_v41  ;;  %4551 = vmatprep.subr.mxu0 %v3740_v42  ;;  %v3833_v41 = vld [vmem:[%s6554_s5 + $0x1f8] sm:$0xff] }
  0x89   : > { %4586 = vmatprep.subr.mxu1 %v3758_v43  ;;  %4552 = vmatpush3.msra.mxu0 %v3740_v42  ;;  %v3812_v42 = vld [vmem:[%s6552_s3 + $0x1e0] sm:$0xff] }
  0x8a   : > { %4587 = vmatpush3.msra.mxu1 %v3758_v43  ;;  %4553 = vmatprep.subr.mxu0 %v3739_v44  ;;  %v3832_v43 = vld [vmem:[%s6554_s5 + $0x1f0] sm:$0xff] }
  0x8b   : > { %4588 = vmatprep.subr.mxu1 %v3757_v45  ;;  %4554 = vmatpush3.msra.mxu0 %v3739_v44  ;;  %v3811_v44 = vld [vmem:[%s6552_s3 + $0x1d8] sm:$0xff] }
  0x8c   : > { %4589 = vmatpush3.msra.mxu1 %v3757_v45  ;;  %4555 = vmatprep.subr.mxu0 %v3738_v46  ;;  %v3831_v45 = vld [vmem:[%s6554_s5 + $0x1e8] sm:$0xff] }
  0x8d   : > { %4590 = vmatprep.subr.mxu1 %v3756_v47  ;;  %4556 = vmatpush3.msra.mxu0 %v3738_v46  ;;  %v3810_v46 = vld [vmem:[%s6552_s3 + $0x1d0] sm:$0xff] }
  0x8e   : > { %4591 = vmatpush3.msra.mxu1 %v3756_v47  ;;  %4557 = vmatprep.subr.mxu0 %v3737_v48  ;;  %v3830_v47 = vld [vmem:[%s6554_s5 + $0x1e0] sm:$0xff] }
  0x8f   : > { %4592 = vmatprep.subr.mxu1 %v3755_v49  ;;  %4558 = vmatpush3.msra.mxu0 %v3737_v48  ;;  %v3809_v48 = vld [vmem:[%s6552_s3 + $0x1c8] sm:$0xff] }
  0x90   : > { %4593 = vmatpush3.msra.mxu1 %v3755_v49  ;;  %4559 = vmatprep.subr.mxu0 %v3736_v50  ;;  %v3829_v49 = vld [vmem:[%s6554_s5 + $0x1d8] sm:$0xff] }
  0x91   : > { %4594 = vmatprep.subr.mxu1 %v3754_v51  ;;  %4560 = vmatpush3.msra.mxu0 %v3736_v50  ;;  %v3808_v50 = vld [vmem:[%s6552_s3 + $0x1c0] sm:$0xff] }
  0x92   : > { %4595 = vmatpush3.msra.mxu1 %v3754_v51  ;;  %4561 = vmatprep.subr.mxu0 %v3735_v52  ;;  %v3828_v51 = vld [vmem:[%s6554_s5 + $0x1d0] sm:$0xff] }
  0x93   : > { %4596 = vmatprep.subr.mxu1 %v3753_v53  ;;  %4562 = vmatpush3.msra.mxu0 %v3735_v52  ;;  %v3807_v52 = vld [vmem:[%s6552_s3 + $0x1b8] sm:$0xff] }
  0x94   : > { %4597 = vmatpush3.msra.mxu1 %v3753_v53  ;;  %4563 = vmatprep.subr.mxu0 %v3734_v54  ;;  %v3827_v53 = vld [vmem:[%s6554_s5 + $0x1c8] sm:$0xff] }
  0x95   : > { %4598 = vmatprep.subr.mxu1 %v3752_v55  ;;  %4564 = vmatpush3.msra.mxu0 %v3734_v54  ;;  %v3806_v54 = vld [vmem:[%s6552_s3 + $0x1b0] sm:$0xff] }
  0x96   : > { %4599 = vmatpush3.msra.mxu1 %v3752_v55  ;;  %4565 = vmatprep.subr.mxu0 %v3733_v56  ;;  %v3826_v55 = vld [vmem:[%s6554_s5 + $0x1c0] sm:$0xff] }
  0x97   : > { %4600 = vmatprep.subr.mxu1 %v3751_v57  ;;  %4566 = vmatpush3.msra.mxu0 %v3733_v56  ;;  %v3805_v56 = vld [vmem:[%s6552_s3 + $0x1a8] sm:$0xff] }
  0x98   : > { %4601 = vmatpush3.msra.mxu1 %v3751_v57  ;;  %4567 = vmatprep.subr.mxu0 %v3732_v58  ;;  %v3825_v57 = vld [vmem:[%s6554_s5 + $0x1b8] sm:$0xff] }
  0x99   : > { %4602 = vmatprep.subr.mxu1 %v3750_v59  ;;  %4568 = vmatpush3.msra.mxu0 %v3732_v58  ;;  %v3804_v58 = vld [vmem:[%s6552_s3 + $0x1a0] sm:$0xff] }
  0x9a   : > { %4603 = vmatpush3.msra.mxu1 %v3750_v59  ;;  %4569 = vmatprep.subr.mxu0 %v3731_v60  ;;  %v3824_v59 = vld [vmem:[%s6554_s5 + $0x1b0] sm:$0xff] }
  0x9b   : > { %4604 = vmatprep.subr.mxu1 %v3749_v61  ;;  %4570 = vmatpush3.msra.mxu0 %v3731_v60  ;;  %v3803_v60 = vld [vmem:[%s6552_s3 + $0x198] sm:$0xff] }
  0x9c   : > { %4605 = vmatpush3.msra.mxu1 %v3749_v61  ;;  %4571 = vmatprep.subr.mxu0 %v3730_v62  ;;  %v3823_v61 = vld [vmem:[%s6554_s5 + $0x1a8] sm:$0xff] }
  0x9d   : > { %4606 = vmatprep.subr.mxu1 %v3748_v63  ;;  %4572 = vmatpush3.msra.mxu0 %v3730_v62  ;;  %v3802_v62 = vld [vmem:[%s6552_s3 + $0x190] sm:$0xff] }
  0x9e   : > { %4607 = vmatpush3.msra.mxu1 %v3748_v63  ;;  %4573 = vmatprep.subr.mxu0 %v3729_v0  ;;  %v3822_v63 = vld [vmem:[%s6554_s5 + $0x1a0] sm:$0xff] }
  0x9f   : > { %4608 = vmatprep.subr.mxu1 %v3747_v1  ;;  %4574 = vmatpush3.msra.mxu0 %v3729_v0  ;;  %v3801_v0 = vld [vmem:[%s6552_s3 + $0x188] sm:$0xff] }
  0xa0   : > { %4609 = vmatpush3.msra.mxu1 %v3747_v1  ;;  %4575 = vmatprep.subr.mxu0 %v3728_v2  ;;  %v3821_v1 = vld [vmem:[%s6554_s5 + $0x198] sm:$0xff] }
  0xa1   : > { %4610 = vmatprep.subr.mxu1 %v3746_v3  ;;  %4576 = vmatpush3.msra.mxu0 %v3728_v2  ;;  %v3800_v2 = vld [vmem:[%s6552_s3 + $0x180] sm:$0xff] }
  0xa2   : > { %4577 = vmatprep.mubr.f32.mxu0 %v5454_v32  ;;  %4611 = vmatpush3.msra.mxu1 %v3746_v3  ;;  %v3820_v3 = vld [vmem:[%s6554_s5 + $0x190] sm:$0xff] }
  0xa3   : > { %4612 = vmatprep.mubr.f32.mxu1 %v5454_v32  ;;  %4578 = vmatmul.mubr.f32.vlgmr.msra.gmra.mxu0 %v5457_v33 }
  0xa4   : > { %4613 = vmatmul.mubr.f32.vlgmr.msra.gmra.mxu1 %v5457_v33  ;;  %4615 = vmatprep.subr.mxu0 %v3779_v4 }
  0xa5   : > { %4647 = vmatprep.mubr.f32.mxu0 %v5454_v32  ;;  %4616 = vmatpush3.msra.mxu0 %v3779_v4  ;;  %v3819_v4 = vld [vmem:[%s6554_s5 + $0x188] sm:$0xff] }
  0xa6   : > { %4650 = vmatprep.subr.mxu1 %v3797_v5  ;;  %4617 = vmatprep.subr.mxu0 %v3778_v6 }
  0xa7   : > { %4651 = vmatpush3.msra.mxu1 %v3797_v5  ;;  %4618 = vmatpush3.msra.mxu0 %v3778_v6  ;;  %v3818_v5 = vld [vmem:[%s6554_s5 + $0x180] sm:$0xff] }
  0xa8   : > { %4652 = vmatprep.subr.mxu1 %v3796_v7  ;;  %4619 = vmatprep.subr.mxu0 %v3777_v8  ;;  %v3672_v6 = vld [vmem:[%s6553_s4] ss:$0 sm:$0xff] }
  0xa9   : > { %4653 = vmatpush3.msra.mxu1 %v3796_v7  ;;  %4620 = vmatpush3.msra.mxu0 %v3777_v8  ;;  %v3671_v8 = vld [vmem:[%s6587_s2] ss:$0 sm:$0xff] }
  0xaa   : > { %4654 = vmatprep.subr.mxu1 %v3795_v9  ;;  %4621 = vmatprep.subr.mxu0 %v3776_v10 }
  0xab   : > { %4655 = vmatpush3.msra.mxu1 %v3795_v9  ;;  %4622 = vmatpush3.msra.mxu0 %v3776_v10 }
  0xac   : > { %4656 = vmatprep.subr.mxu1 %v3794_v11  ;;  %4623 = vmatprep.subr.mxu0 %v3775_v12 }
  0xad   : > { %4657 = vmatpush3.msra.mxu1 %v3794_v11  ;;  %4624 = vmatpush3.msra.mxu0 %v3775_v12 }
  0xae   : > { %4658 = vmatprep.subr.mxu1 %v3793_v13  ;;  %4625 = vmatprep.subr.mxu0 %v3774_v14 }
  0xaf   : > { %4659 = vmatpush3.msra.mxu1 %v3793_v13  ;;  %4626 = vmatpush3.msra.mxu0 %v3774_v14 }
  0xb0   : > { %4660 = vmatprep.subr.mxu1 %v3792_v15  ;;  %4627 = vmatprep.subr.mxu0 %v3773_v16 }
  0xb1   : > { %4661 = vmatpush3.msra.mxu1 %v3792_v15  ;;  %4628 = vmatpush3.msra.mxu0 %v3773_v16  ;;  %v3691_v15 = vld [vmem:[%s6587_s2 + $0x1] ss:$0 sm:$0xff] }
  0xb2   : > { %4662 = vmatprep.subr.mxu1 %v3791_v17  ;;  %4629 = vmatprep.subr.mxu0 %v3772_v18 }
  0xb3   : > { %4663 = vmatpush3.msra.mxu1 %v3791_v17  ;;  %4630 = vmatpush3.msra.mxu0 %v3772_v18 }
  0xb4   : > { %4664 = vmatprep.subr.mxu1 %v3790_v19  ;;  %4631 = vmatprep.subr.mxu0 %v3771_v20 }
  0xb5   : > { %4665 = vmatpush3.msra.mxu1 %v3790_v19  ;;  %4632 = vmatpush3.msra.mxu0 %v3771_v20  ;;  %v3709_v20 = vld [vmem:[%s6553_s4 + $0x1] ss:$0 sm:$0xff] }
  0xb6   : > { %4666 = vmatprep.subr.mxu1 %v3789_v21  ;;  %4633 = vmatprep.subr.mxu0 %v3770_v22 }
  0xb7   : > { %4667 = vmatpush3.msra.mxu1 %v3789_v21  ;;  %4634 = vmatpush3.msra.mxu0 %v3770_v22 }
  0xb8   : > { %4668 = vmatprep.subr.mxu1 %v3788_v23  ;;  %4635 = vmatprep.subr.mxu0 %v3769_v24 }
  0xb9   : > { %4669 = vmatpush3.msra.mxu1 %v3788_v23  ;;  %4636 = vmatpush3.msra.mxu0 %v3769_v24 }
  0xba   : > { %4670 = vmatprep.subr.mxu1 %v3787_v25  ;;  %4637 = vmatprep.subr.mxu0 %v3768_v26 }
  0xbb   : > { %4671 = vmatpush3.msra.mxu1 %v3787_v25  ;;  %4638 = vmatpush3.msra.mxu0 %v3768_v26 }
  0xbc   : > { %4672 = vmatprep.subr.mxu1 %v3786_v27  ;;  %4639 = vmatprep.subr.mxu0 %v3767_v28 }
  0xbd   : > { %4673 = vmatpush3.msra.mxu1 %v3786_v27  ;;  %4640 = vmatpush3.msra.mxu0 %v3767_v28  ;;  %v3763_v28 = vld [vmem:[%s6553_s4 + $0x2] ss:$0 sm:$0xff] }
  0xbe   : > { %4674 = vmatprep.subr.mxu1 %v3785_v29  ;;  %4641 = vmatprep.subr.mxu0 %v3766_v30 }
  0xbf   : > { %4675 = vmatpush3.msra.mxu1 %v3785_v29  ;;  %4642 = vmatpush3.msra.mxu0 %v3766_v30  ;;  %v3745_v30 = vld [vmem:[%s6587_s2 + $0x2] ss:$0 sm:$0xff] }
  0xc0   : > { %4676 = vmatprep.subr.mxu1 %v3784_v31  ;;  %4643 = vmatprep.subr.mxu0 %v3765_v34 }
  0xc1   : > { %4677 = vmatpush3.msra.mxu1 %v3784_v31  ;;  %4644 = vmatpush3.msra.mxu0 %v3765_v34 }
  0xc2   : > { %4678 = vmatprep.subr.mxu1 %v3783_v35  ;;  %4645 = vmatprep.subr.mxu0 %v3764_v36 }
  0xc3   : > { %4679 = vmatpush3.msra.mxu1 %v3783_v35  ;;  %4646 = vmatpush3.msra.mxu0 %v3764_v36 }
  0xc4   : > { %4680 = vmatprep.subr.mxu1 %v3782_v37  ;;  %4648 = vmatmul.mubr.f32.vlgmr.msra.gmra.mxu0 %v5457_v33 }
  0xc5   : > { %4685 = vmatprep.subr.mxu0 %v3815_v38  ;;  %4717 = vmatprep.mubr.f32.mxu0 %v5454_v32 }
  0xc6   : > { %4686 = vmatpush3.msra.mxu0 %v3815_v38  ;;  %4681 = vmatpush3.msra.mxu1 %v3782_v37 }
  0xc7   : > { %4687 = vmatprep.subr.mxu0 %v3814_v39  ;;  %4682 = vmatprep.mubr.f32.mxu1 %v5454_v32 }
  0xc8   : > { %4688 = vmatpush3.msra.mxu0 %v3814_v39  ;;  %4683 = vmatmul.mubr.f32.vlgmr.msra.gmra.mxu1 %v5457_v33  ;;  %v3673_v39 = vld [vmem:[%s6555_s6] ss:$0 sm:$0xff] }
  0xc9   : > { %4689 = vmatprep.subr.mxu0 %v3813_v40  ;;  %4720 = vmatprep.subr.mxu1 %v3833_v41 }
  0xca   : > { %4690 = vmatpush3.msra.mxu0 %v3813_v40  ;;  %4721 = vmatpush3.msra.mxu1 %v3833_v41 }
  0xcb   : > { %4691 = vmatprep.subr.mxu0 %v3812_v42  ;;  %4722 = vmatprep.subr.mxu1 %v3832_v43 }
  0xcc   : > { %4692 = vmatpush3.msra.mxu0 %v3812_v42  ;;  %4723 = vmatpush3.msra.mxu1 %v3832_v43  ;;  %v3781_v43 = vld [vmem:[%s6555_s6 + $0x2] ss:$0 sm:$0xff] }
  0xcd   : > { %4693 = vmatprep.subr.mxu0 %v3811_v44  ;;  %4724 = vmatprep.subr.mxu1 %v3831_v45 }
  0xce   : > { %4694 = vmatpush3.msra.mxu0 %v3811_v44  ;;  %4725 = vmatpush3.msra.mxu1 %v3831_v45 }
  0xcf   : > { %4695 = vmatprep.subr.mxu0 %v3810_v46  ;;  %4726 = vmatprep.subr.mxu1 %v3830_v47 }
  0xd0   : > { %4696 = vmatpush3.msra.mxu0 %v3810_v46  ;;  %4727 = vmatpush3.msra.mxu1 %v3830_v47 }
  0xd1   : > { %4697 = vmatprep.subr.mxu0 %v3809_v48  ;;  %4728 = vmatprep.subr.mxu1 %v3829_v49 }
  0xd2   : > { %4698 = vmatpush3.msra.mxu0 %v3809_v48  ;;  %4729 = vmatpush3.msra.mxu1 %v3829_v49  ;;  %v3799_v49 = vld [vmem:[%s6587_s2 + $0x3] ss:$0 sm:$0xff] }
  0xd3   : > { %4699 = vmatprep.subr.mxu0 %v3808_v50  ;;  %4730 = vmatprep.subr.mxu1 %v3828_v51 }
  0xd4   : > { %4700 = vmatpush3.msra.mxu0 %v3808_v50  ;;  %4731 = vmatpush3.msra.mxu1 %v3828_v51 }
  0xd5   : > { %4701 = vmatprep.subr.mxu0 %v3807_v52  ;;  %4732 = vmatprep.subr.mxu1 %v3827_v53 }
  0xd6   : > { %4702 = vmatpush3.msra.mxu0 %v3807_v52  ;;  %4733 = vmatpush3.msra.mxu1 %v3827_v53  ;;  %v3817_v52 = vld [vmem:[%s6553_s4 + $0x3] ss:$0 sm:$0xff] }
  0xd7   : > { %4703 = vmatprep.subr.mxu0 %v3806_v54  ;;  %4734 = vmatprep.subr.mxu1 %v3826_v55 }
  0xd8   : > { %4704 = vmatpush3.msra.mxu0 %v3806_v54  ;;  %4735 = vmatpush3.msra.mxu1 %v3826_v55 }
  0xd9   : > { %4705 = vmatprep.subr.mxu0 %v3805_v56  ;;  %4736 = vmatprep.subr.mxu1 %v3825_v57 }
  0xda   : > { %4706 = vmatpush3.msra.mxu0 %v3805_v56  ;;  %4737 = vmatpush3.msra.mxu1 %v3825_v57  ;;  %v3727_v57 = vld [vmem:[%s6555_s6 + $0x1] ss:$0 sm:$0xff] }
  0xdb   : > { %4707 = vmatprep.subr.mxu0 %v3804_v58  ;;  %4738 = vmatprep.subr.mxu1 %v3824_v59 }
  0xdc   : > { %4708 = vmatpush3.msra.mxu0 %v3804_v58  ;;  %4739 = vmatpush3.msra.mxu1 %v3824_v59  ;;  %v6027_v59 = vld [vmem:[%s6555_s6 + $0x3] ss:$0 sm:$0xff] }
  0xdd   : > { %4709 = vmatprep.subr.mxu0 %v3803_v60  ;;  %4740 = vmatprep.subr.mxu1 %v3823_v61 }
  0xde   : > { %4710 = vmatpush3.msra.mxu0 %v3803_v60  ;;  %4741 = vmatpush3.msra.mxu1 %v3823_v61 }
  0xdf   : > { %4711 = vmatprep.subr.mxu0 %v3802_v62  ;;  %4742 = vmatprep.subr.mxu1 %v3822_v63 }
  0xe0   : > { %4712 = vmatpush3.msra.mxu0 %v3802_v62  ;;  %4743 = vmatpush3.msra.mxu1 %v3822_v63 }
  0xe1   : > { %4713 = vmatprep.subr.mxu0 %v3801_v0  ;;  %4744 = vmatprep.subr.mxu1 %v3821_v1 }
  0xe2   : > { %4714 = vmatpush3.msra.mxu0 %v3801_v0  ;;  %4745 = vmatpush3.msra.mxu1 %v3821_v1 }
  0xe3   : > { %4715 = vmatprep.subr.mxu0 %v3800_v2  ;;  %4746 = vmatprep.subr.mxu1 %v3820_v3 }
  0xe4   : > { %4716 = vmatpush3.msra.mxu0 %v3800_v2  ;;  %4747 = vmatpush3.msra.mxu1 %v3820_v3 }
  0xe5   : > { %4718 = vmatmul.mubr.f32.vlgmr.msra.gmra.mxu0 %v5457_v33  ;;  %4748 = vmatprep.subr.mxu1 %v3819_v4 }
  0xe6   : > { %4752 = vmatprep.mubr.f32.mxu1 %v5454_v32  ;;  %4749 = vmatpush3.msra.mxu1 %v3819_v4 }
  0xe7   : > { %4750 = vmatprep.subr.mxu1 %v3818_v5 }
  0xe8   : > { %4751 = vmatpush3.msra.mxu1 %v3818_v5 }
  0xe9   : > { %4753 = vmatmul.mubr.f32.vlgmr.msra.gmra.mxu1 %v5457_v33 }
  0xfd   : > { %v4369_v7 = vpop.f32.mrf.mxu0 }
  0xfe   : > { %v4404_v9 = vpop.f32.mrf.mxu1  ;;  %v647_v33 = vadd.f32 %v4369_v7, %v3671_v8 }
  0xff   : > { %v745_v10 = vadd.f32 %v4404_v9, %v3672_v6  ;;  %v641_v11 = vpop.f32.mrf.mxu0 }
 0x100   : > { %v739_v12 = vpop.f32.mrf.mxu1  ;;  %v642_v32 = vadd.f32 %v3671_v8, %v641_v11 }
 0x101   : > { %4755 = vmatprep.subr.msk.mxu0 %vm1762_vm0, %v745_v10  ;;  %v740_v13 = vadd.f32 %v3672_v6, %v739_v12 }
 0x102   : > { %4756 = vmatpush3.xpose.msk.msra.mxu0 %vm1762_vm0, %v745_v10  ;;  %4759 = vmatprep.mubr.msk.f32.mxu0 %vm1762_vm0, %v642_v32 }
 0x103   : > { %4757 = vmatprep.subr.msk.mxu0 %vm1762_vm0, %v740_v13 }
 0x106   : > { %4758 = vmatpush3.xpose.msk.msra.mxu0 %vm1762_vm0, %v740_v13 }
 0x109   : > { %4760 = vmatmul.mubr.msk.f32.vlgmr.msra.gmra.mxu0 %vm1762_vm0, %v647_v33 }
 0x11f   : > { %v4439_v18 = vpop.f32.mrf.mxu0 }
 0x120   : > { %v843_v40 = vadd.f32 %v4439_v18, %v3673_v39 }
 0x121   : > { %v4474_v14 = vpop.f32.mrf.mxu1  ;;  %v837_v19 = vpop.f32.mrf.mxu0 }
 0x122   : > { %v943_v25 = vadd.f32 %v4474_v14, %v3691_v15  ;;  %v838_v42 = vadd.f32 %v3673_v39, %v837_v19 }
 0x123   : > { %v937_v16 = vpop.f32.mrf.mxu1 }
 0x124   : > { %v938_v17 = vadd.f32 %v3691_v15, %v937_v16 }
 0x126   : > { %4766 = vmatprep.mubr.msk.f32.mxu1 %vm1762_vm0, %v938_v17 }
 0x141   : > { %v4509_v21 = vpop.f32.mrf.mxu0 }
 0x142   : > { %v1043_v22 = vadd.f32 %v4509_v21, %v3709_v20 }
 0x143   : > { %v1037_v23 = vpop.f32.mrf.mxu0  ;;  %v4544_v26 = vpop.f32.mrf.mxu1 }
 0x144   : > { %v1038_v24 = vadd.f32 %v3709_v20, %v1037_v23  ;;  %4762 = vmatprep.subr.msk.mxu1 %vm1762_vm0, %v1043_v22  ;;  %v1143_v58 = vadd.f32 %v4544_v26, %v3727_v57 }
 0x145   : > { %4763 = vmatpush3.xpose.msk.msra.mxu1 %vm1762_vm0, %v1043_v22  ;;  %v1137_v27 = vpop.f32.mrf.mxu1 }
 0x146   : > { %4764 = vmatprep.subr.msk.mxu1 %vm1762_vm0, %v1038_v24  ;;  %v1138_v62 = vadd.f32 %v3727_v57, %v1137_v27 }
 0x149   : > { %4765 = vmatpush3.xpose.msk.msra.mxu1 %vm1762_vm0, %v1038_v24 }
 0x14c   : > { %4767 = vmatmul.mubr.msk.f32.vlgmr.msra.gmra.mxu1 %vm1762_vm0, %v943_v25 }
 0x163   : > { %v4579_v29 = vpop.f32.mrf.mxu0 }
 0x164   : > { %v4614_v31 = vpop.f32.mrf.mxu1  ;;  %v1243_v41 = vadd.f32 %v4579_v29, %v3745_v30 }
 0x165   : > { %v1343_v34 = vadd.f32 %v4614_v31, %v3763_v28  ;;  %v1237_v35 = vpop.f32.mrf.mxu0 }
 0x166   : > { %v1337_v36 = vpop.f32.mrf.mxu1  ;;  %v1238_v37 = vadd.f32 %v3745_v30, %v1237_v35 }
 0x167   : > { %4769 = vmatprep.subr.msk.mxu0 %vm1762_vm0, %v1343_v34  ;;  %v1338_v38 = vadd.f32 %v3763_v28, %v1337_v36 }
 0x168   : > { %4770 = vmatpush3.xpose.msk.msra.mxu0 %vm1762_vm0, %v1343_v34  ;;  %4773 = vmatprep.mubr.msk.f32.mxu0 %vm1762_vm0, %v1238_v37 }
 0x169   : > { %4771 = vmatprep.subr.msk.mxu0 %vm1762_vm0, %v1338_v38 }
 0x16c   : > { %4772 = vmatpush3.xpose.msk.msra.mxu0 %vm1762_vm0, %v1338_v38 }
 0x16d   : > { %4783 = vmatprep.subr.mxu0 %v843_v40 }
 0x16f   : > { %4774 = vmatmul.mubr.msk.f32.vlgmr.msra.gmra.mxu0 %vm1762_vm0, %v1243_v41 }
 0x170   : > { %4784 = vmatpush3.msra.mxu0 %v843_v40 }
 0x171   : > { %4785 = vmatprep.subr.mxu0 %v838_v42 }
 0x172   : > { %4786 = vmatpush3.msra.mxu0 %v838_v42 }
 0x184   : > { %v4649_v44 = vpop.f32.mrf.mxu0 }
 0x185   : > { %v6005_v45 = vadd.f32 %v4649_v44, %v3781_v43 }
 0x186   : > { %v1437_v46 = vpop.f32.mrf.mxu0 }
 0x187   : > { %v6007_v47 = vadd.f32 %v3781_v43, %v1437_v46  ;;  %4797 = vmatprep.subr.mxu0 %v6005_v45 }
 0x188   : > { %v4684_v48 = vpop.f32.mrf.mxu1 }
 0x189   : > { %v1543_v60 = vadd.f32 %v4684_v48, %v3799_v49 }
 0x18a   : > { %v1537_v50 = vpop.f32.mrf.mxu1 }
 0x18b   : > { %v1538_v51 = vadd.f32 %v3799_v49, %v1537_v50 }
 0x18d   : > { %4780 = vmatprep.mubr.msk.f32.mxu1 %vm1762_vm0, %v1538_v51 }
 0x1a5   : > { %v4719_v53 = vpop.f32.mrf.mxu0 }
 0x1a6   : > { %v1643_v54 = vadd.f32 %v4719_v53, %v3817_v52 }
 0x1a7   : > { %v1637_v55 = vpop.f32.mrf.mxu0 }
 0x1a8   : > { %v1638_v56 = vadd.f32 %v3817_v52, %v1637_v55  ;;  %4776 = vmatprep.subr.msk.mxu1 %vm1762_vm0, %v1643_v54 }
 0x1a9   : > { %4777 = vmatpush3.xpose.msk.msra.mxu1 %vm1762_vm0, %v1643_v54  ;;  %v4754_v61 = vpop.f32.mrf.mxu1 }
 0x1aa   : > { %4778 = vmatprep.subr.msk.mxu1 %vm1762_vm0, %v1638_v56  ;;  %v6031_v63 = vadd.f32 %v4754_v61, %v6027_v59 }
 0x1ab   : > { %v6036_v4 = vpop.f32.mrf.mxu1 }
 0x1ad   : > { %4779 = vmatpush3.xpose.msk.msra.mxu1 %vm1762_vm0, %v1638_v56 }
 0x1ae   : > { %4790 = vmatprep.subr.mxu1 %v1143_v58 }
 0x1b0   : > { %4781 = vmatmul.mubr.msk.f32.vlgmr.msra.gmra.mxu1 %vm1762_vm0, %v1543_v60 }
 0x1b1   : > { %4791 = vmatpush3.msra.mxu1 %v1143_v58 }
 0x1b2   : > { %4792 = vmatprep.subr.mxu1 %v1138_v62 }
 0x1b3   : > { %4793 = vmatpush3.msra.mxu1 %v1138_v62 }
 0x1b4   : > { %4804 = vmatprep.subr.mxu1 %v6031_v63 }
 0x1c9   : > { %v4761_v0 = vpop.f32.mrf.mxu0 }
 0x1ca   : > { %v2115_v3 = vsel %vm2111_vm1, %v4761_v0, -inf }
 0x1cb   : > { %v1841_v1 = vpop.f32.mrf.mxu0 }
 0x1cc   : > { %v2112_v2 = vsel %vm2111_vm1, %v1841_v1, -inf }
 0x1cd   : > { %2113 = vmax.xlane.f32.xlu0 %v2112_v2 }
 0x1d1   : > { %2116 = vmax.xlane.f32.xlu0 %v2115_v3  ;;  %v1749_v3 = vld [vmem:[%s6556_s7 + $0x18] sm:$0xff] }
 0x20c   : > { %v4768_v5 = vpop.f32.mrf.mxu1 }
 0x20d   : > { %v2121_v6 = vsel %vm2111_vm1, %v4768_v5, -inf }
 0x20e   : > { %2122 = vmax.xlane.f32.xlu1 %v2121_v6  ;;  %v1928_v7 = vpop.f32.mrf.mxu1 }
 0x20f   : > { %v2118_v8 = vsel %vm2111_vm1, %v1928_v7, -inf }
 0x212   : > { %2119 = vmax.xlane.f32.xlu1 %v2118_v8 }
 0x22f   : > { %v4775_v9 = vpop.f32.mrf.mxu0 }
 0x230   : > { %v2127_v10 = vsel %vm2111_vm1, %v4775_v9, -inf }
 0x231   : > { %2128 = vmax.xlane.f32.xlu1 %v2127_v10  ;;  %v2015_v11 = vpop.f32.mrf.mxu0 }
 0x232   : > { %v2124_v12 = vsel %vm2111_vm1, %v2015_v11, -inf }
 0x233   : > { %2125 = vmax.xlane.f32.xlu0 %v2124_v12 }
 0x256   : > { %v2114_v32 = vpop.xlane.xlu0 %2113 }
 0x257   : > { %v2136_v14 = vsub.f32 %v1841_v1, %v2114_v32 }
 0x259   : > { %v2144_v16 = vmul.f32 1.442695, %v2136_v14 }
 0x25a   : > { %v2117_v13 = vpop.xlane.xlu0 %2116 }
 0x25b   : > { %v2137_v33 = vsub.f32 %v4761_v0, %v2117_v13 }
 0x25d   : > { %v2146_v15 = vmul.f32 1.442695, %v2137_v33 }
 0x25f   : > { %5106 = vpow2.f32 %v2146_v15  ;;  %v1757_v15 = vld [vmem:[%s6556_s7 + $0x58] sm:$0xff] }
 0x260   : > { %5108 = vpow2.f32 %v2144_v16 }
 0x26c   : > { %v5107_v17 = vpop.eup %5106 }
 0x26d   : > { %v2163_v22 = vsel %vm2111_vm1, %v5107_v17, 0.0  ;;  %v5109_v23 = vpop.eup %5108 }
 0x26e   : > { %v2160_v24 = vsel %vm2111_vm1, %v5109_v23, 0.0 }
 0x270   : > { %v4782_v18 = vpop.f32.mrf.mxu1 }
 0x271   : > { %v2133_v19 = vsel %vm2111_vm1, %v4782_v18, -inf }
 0x272   : > { %v2102_v20 = vpop.f32.mrf.mxu1  ;;  %2134 = vmax.xlane.f32.xlu1 %v2133_v19 }
 0x273   : > { %v2130_v21 = vsel %vm2111_vm1, %v2102_v20, -inf }
 0x274   : > { %2131 = vmax.xlane.f32.xlu0 %v2130_v21 }
 0x276   : > { %2164 = vadd.xlane.f32.xlu1 %v2163_v22  ;;  %v1752_v22 = vld [vmem:[%s6556_s7 + $0x30] sm:$0xff] }
 0x278   : > { %2161 = vadd.xlane.f32.xlu0 %v2160_v24  ;;  %v1750_v24 = vld [vmem:[%s6556_s7 + $0x20] sm:$0xff] }
 0x297   : > { %v2123_v25 = vpop.xlane.xlu1 %2122 }
 0x298   : > { %v2139_v26 = vsub.f32 %v4768_v5, %v2123_v25  ;;  %v1761_v25 = vld [vmem:[%s6556_s7 + $0x78] sm:$0xff] }
 0x29a   : > { %v2150_v27 = vmul.f32 1.442695, %v2139_v26 }
 0x29b   : > { %v2120_v28 = vpop.xlane.xlu1 %2119 }
 0x29c   : > { %5110 = vpow2.f32 %v2150_v27  ;;  %v2138_v29 = vsub.f32 %v1928_v7, %v2120_v28  ;;  %v1756_v28 = vld [vmem:[%s6556_s7 + $0x50] sm:$0xff] }
 0x29e   : > { %v2148_v30 = vmul.f32 1.442695, %v2138_v29  ;;  %v1755_v29 = vld [vmem:[%s6556_s7 + $0x48] sm:$0xff] }
 0x2a0   : > { %5112 = vpow2.f32 %v2148_v30  ;;  %v1754_v30 = vld [vmem:[%s6556_s7 + $0x40] sm:$0xff] }
 0x2a9   : > { %v5111_v31 = vpop.eup %5110 }
 0x2aa   : > { %v2169_v34 = vsel %vm2111_vm1, %v5111_v31, 0.0 }
 0x2ab   : > { %2170 = vadd.xlane.f32.xlu1 %v2169_v34 }
 0x2ad   : > { %v5113_v35 = vpop.eup %5112 }
 0x2ae   : > { %v2166_v36 = vsel %vm2111_vm1, %v5113_v35, 0.0 }
 0x2af   : > { %2167 = vadd.xlane.f32.xlu0 %v2166_v36  ;;  %v1759_v36 = vld [vmem:[%s6556_s7 + $0x68] sm:$0xff] }
 0x2ba   : > { %v2129_v37 = vpop.xlane.xlu1 %2128 }
 0x2bb   : > { %v2141_v38 = vsub.f32 %v4775_v9, %v2129_v37  ;;  %v1758_v37 = vld [vmem:[%s6556_s7 + $0x60] sm:$0xff] }
 0x2bc   : > { %v2126_v39 = vpop.xlane.xlu0 %2125 }
 0x2bd   : > { %v2154_v40 = vmul.f32 1.442695, %v2141_v38  ;;  %v2140_v41 = vsub.f32 %v2015_v11, %v2126_v39  ;;  %v1753_v11 = vld [vmem:[%s6556_s7 + $0x38] sm:$0xff] }
 0x2bf   : > { %5114 = vpow2.f32 %v2154_v40  ;;  %v2152_v42 = vmul.f32 1.442695, %v2140_v41 }
 0x2c1   : > { %5116 = vpow2.f32 %v2152_v42 }
 0x2cc   : > { %v5115_v43 = vpop.eup %5114 }
 0x2cd   : > { %v2175_v44 = vsel %vm2111_vm1, %v5115_v43, 0.0 }
 0x2ce   : > { %v5117_v46 = vpop.eup %5116  ;;  %2176 = vadd.xlane.f32.xlu1 %v2175_v44 }
 0x2cf   : > { %v2172_v48 = vsel %vm2111_vm1, %v5117_v46, 0.0 }
 0x2d0   : > { %2173 = vadd.xlane.f32.xlu0 %v2172_v48 }
 0x2fb   : > { %v2135_v49 = vpop.xlane.xlu1 %2134 }
 0x2fc   : > { %v2143_v50 = vsub.f32 %v4782_v18, %v2135_v49 }
 0x2fd   : > { %v2132_v51 = vpop.xlane.xlu0 %2131 }
 0x2fe   : > { %v2158_v52 = vmul.f32 1.442695, %v2143_v50  ;;  %v2142_v53 = vsub.f32 %v2102_v20, %v2132_v51 }
 0x2ff   : > { %v2165_v54 = vpop.xlane.xlu1 %2164 }
 0x300   : > { %5118 = vpow2.f32 %v2158_v52  ;;  %v2156_v55 = vmul.f32 1.442695, %v2142_v53 }
 0x301   : > { %5120 = vrcp.f32 %v2165_v54  ;;  %v2162_v56 = vpop.xlane.xlu0 %2161  ;;  %v3868_v54 = vld [vmem:[%s6557_s8] ss:$0 sm:$0xff] }
 0x302   : > { %5122 = vpow2.f32 %v2156_v55 }
 0x303   : > { %5124 = vrcp.f32 %v2162_v56 }
 0x30d   : > { %v5119_v57 = vpop.eup %5118 }
 0x30e   : > { %v5121_v58 = vpop.eup %5120  ;;  %v2181_v60 = vsel %vm2111_vm1, %v5119_v57, 0.0 }
 0x30f   : > { %v5123_v61 = vpop.eup %5122  ;;  %2182 = vadd.xlane.f32.xlu1 %v2181_v60  ;;  %v2193_v2 = vmul.f32 %v5121_v58, %v5107_v17 }
 0x310   : > { %v5125_v62 = vpop.eup %5124  ;;  %v2178_v0 = vsel %vm2111_vm1, %v5123_v61, 0.0 }
 0x311   : > { %2179 = vadd.xlane.f32.xlu0 %v2178_v0  ;;  %v2192_v1 = vmul.f32 %v5125_v62, %v5109_v23  ;;  %v1751_v23 = vld [vmem:[%s6556_s7 + $0x28] sm:$0xff] }
 0x312   : > { %v5146_v62 = vld [vmem:[%s5445_s20 + $0x8] sm:$0xff] }
 0x313   : > { %4787 = vmatprep.mubr.msk.f32.mxu0 %vm2111_vm1, %v2192_v1  ;;  %v5147_v1 = vld [vmem:[%s5445_s20] sm:$0xff]  ;;  %s3668_s20 = sshll.u32 %s540_s27, 4 }
 0x314   : > { %4788 = vmatmul.mubr.msk.f32.vlgmr.msra.gmra.mxu0 %vm2111_vm1, %v2193_v2  ;;  %s542_s29 = scalar_lea.vmem [#allocation2], %s3668_s20  ;;  %s5210_s20 = smov [#allocation2]  }
 0x315   : > { %4798 = vmatpush3.msra.mxu0 %v6005_v45  ;;  %v1738_v45 = vadd.f32 %v6027_v59, %v6036_v4  ;;  %v1748_v59 = vld [vmem:[%s6556_s7 + $0x10] sm:$0xff]  ;;  %v1746_v4 = vld [vmem:[%s6556_s7] sm:$0xff]  ;;  %s3602_s30 = sshll.u32 %s542_s29, 4  ;;  %s5152_s19 = sshll.u32 %s5210_s20, 4  ;;  %s6507_s30 = int_to_ptr.vmem [resolvable:$true] %s3602_s30  ;;  %s5153_s19 = int_to_ptr.vmem [resolvable:$false] %s5152_s19 }
 0x316   : > { %4799 = vmatprep.subr.mxu0 %v6007_v47  ;;  %s5148_s28 = scalar_lea.vmem %s6507_s30, 256  ;;  %s5154_s26 = scalar_lea.vmem %s5153_s19, 512 }
 0x317   : > { %4800 = vmatpush3.msra.mxu0 %v6007_v47  ;;  %p5149_p11 = scmp.ne.s32.totalorder %s6507_s30, %s5148_s28  ;;  %p5155_p0 = scmp.lt.s32.totalorder %s6507_s30, %s5153_s19 }
 0x318   : > { %4811 = vmatprep.subr.mxu0 %v1749_v3  ;;  %p5156_p1 = scmp.lt.s32.totalorder %s5154_s26, %s5148_s28 }
 0x319   : > { %p5150_p12 = pnand %p5149_p11, %p5341_p5 }
 0x31a   : > { %p5157_p2 = por %p5156_p1, %p5155_p0 }
 0x31b   : > { %p5151_p13 = pneg %p5150_p12 }
 0x31d   : > { %p5158_p3 = pnand %p5157_p2, %p5151_p13 }
 0x334   : > { %v2171_v5 = vpop.xlane.xlu1 %2170 }
 0x335   : > { %5126 = vrcp.f32 %v2171_v5 }
 0x338   : > { %v2168_v6 = vpop.xlane.xlu0 %2167 }
 0x339   : > { %5128 = vrcp.f32 %v2168_v6  ;;  %v3886_v6 = vld [vmem:[%s6560_s11 + $0xf8] sm:$0xff] }
 0x342   : > { %v5127_v7 = vpop.eup %5126 }
 0x343   : > { %v2195_v10 = vmul.f32 %v5127_v7, %v5111_v31  ;;  %v2977_v7 = vld [vmem:[%s6560_s11 + $0x78] sm:$0xff] }
 0x346   : > { %v5129_v8 = vpop.eup %5128 }
 0x347   : > { %v2194_v9 = vmul.f32 %v5129_v8, %v5113_v35  ;;  %v1760_v35 = vld [vmem:[%s6556_s7 + $0x70] sm:$0xff] }
 0x348   : > { %v3885_v8 = vld [vmem:[%s6560_s11 + $0xf0] sm:$0xff] }
 0x349   : > { %4794 = vmatprep.mubr.msk.f32.mxu1 %vm2111_vm1, %v2194_v9  ;;  %v2976_v9 = vld [vmem:[%s6560_s11 + $0x70] sm:$0xff] }
 0x34a   : > { %4795 = vmatmul.mubr.msk.f32.vlgmr.msra.gmra.mxu1 %vm2111_vm1, %v2195_v10  ;;  %v3884_v10 = vld [vmem:[%s6560_s11 + $0xe8] sm:$0xff] }
 0x34b   : > { %4805 = vmatpush3.msra.mxu1 %v6031_v63  ;;  %v1747_v63 = vld [vmem:[%s6556_s7 + $0x8] sm:$0xff] }
 0x34c   : > { %4806 = vmatprep.subr.mxu1 %v1738_v45 }
 0x34d   : > { %4807 = vmatpush3.msra.mxu1 %v1738_v45  ;;  %v2975_v45 = vld [vmem:[%s6560_s11 + $0x68] sm:$0xff] }
 0x34e   : > { %4822 = vmatprep.subr.mxu1 %v1753_v11 }
 0x357   : > { %v2177_v47 = vpop.xlane.xlu1 %2176 }
 0x358   : > { %5130 = vrcp.f32 %v2177_v47  ;;  %v3883_v47 = vld [vmem:[%s6560_s11 + $0xe0] sm:$0xff] }
 0x359   : > { %v2174_v12 = vpop.xlane.xlu0 %2173 }
 0x35a   : > { %5132 = vrcp.f32 %v2174_v12  ;;  %v3882_v12 = vld [vmem:[%s6560_s11 + $0xd8] sm:$0xff] }
 0x365   : > { %v5131_v32 = vpop.eup %5130 }
 0x366   : > { %v2197_v14 = vmul.f32 %v5131_v32, %v5115_v43  ;;  %v2973_v32 = vld [vmem:[%s6560_s11 + $0x58] sm:$0xff] }
 0x367   : > { %v5133_v13 = vpop.eup %5132 }
 0x368   : > { %v2196_v33 = vmul.f32 %v5133_v13, %v5117_v46  ;;  %v3881_v13 = vld [vmem:[%s6560_s11 + $0xd0] sm:$0xff] }
 0x36a   : > { %4801 = vmatprep.mubr.msk.f32.mxu0 %vm2111_vm1, %v2196_v33  ;;  %v2972_v33 = vld [vmem:[%s6560_s11 + $0x50] sm:$0xff] }
 0x36b   : > { %4802 = vmatmul.mubr.msk.f32.vlgmr.msra.gmra.mxu0 %vm2111_vm1, %v2197_v14  ;;  %v3880_v14 = vld [vmem:[%s6560_s11 + $0xc8] sm:$0xff] }
 0x36c   : > { %4812 = vmatpush3.msra.mxu0 %v1749_v3 }
 0x36d   : > { %4813 = vmatprep.subr.mxu0 %v1748_v59 }
 0x36e   : > { %4814 = vmatpush3.msra.mxu0 %v1748_v59  ;;  %v2971_v59 = vld [vmem:[%s6560_s11 + $0x48] sm:$0xff] }
 0x36f   : > { %4815 = vmatprep.subr.mxu0 %v1747_v63 }
 0x370   : > { %4816 = vmatpush3.msra.mxu0 %v1747_v63  ;;  %v3879_v63 = vld [vmem:[%s6560_s11 + $0xc0] sm:$0xff] }
 0x371   : > { %4817 = vmatprep.subr.mxu0 %v1746_v4 }
 0x372   : > { %4818 = vmatpush3.msra.mxu0 %v1746_v4  ;;  %v2970_v4 = vld [vmem:[%s6560_s11 + $0x40] sm:$0xff] }
 0x373   : > { %4833 = vmatprep.subr.mxu0 %v1757_v15 }
 0x398   : > { %v2183_v16 = vpop.xlane.xlu1 %2182 }
 0x399   : > { %5134 = vrcp.f32 %v2183_v16  ;;  %v2969_v16 = vld [vmem:[%s6560_s11 + $0x38] sm:$0xff] }
 0x39a   : > { %v2180_v17 = vpop.xlane.xlu0 %2179 }
 0x39b   : > { %5136 = vrcp.f32 %v2180_v17  ;;  %v3877_v17 = vld [vmem:[%s6560_s11 + $0xb0] sm:$0xff] }
 0x3a6   : > { %v5135_v18 = vpop.eup %5134 }
 0x3a7   : > { %v2199_v21 = vmul.f32 %v5135_v18, %v5119_v57  ;;  %v2968_v18 = vld [vmem:[%s6560_s11 + $0x30] sm:$0xff] }
 0x3a8   : > { %v5137_v19 = vpop.eup %5136 }
 0x3a9   : > { %v2198_v20 = vmul.f32 %v5137_v19, %v5123_v61  ;;  %v3876_v19 = vld [vmem:[%s6560_s11 + $0xa8] sm:$0xff] }
 0x3ab   : > { %4808 = vmatprep.mubr.msk.f32.mxu1 %vm2111_vm1, %v2198_v20  ;;  %v2967_v20 = vld [vmem:[%s6560_s11 + $0x28] sm:$0xff] }
 0x3ac   : > { %4809 = vmatmul.mubr.msk.f32.vlgmr.msra.gmra.mxu1 %vm2111_vm1, %v2199_v21  ;;  %v3875_v21 = vld [vmem:[%s6560_s11 + $0xa0] sm:$0xff] }
 0x3ad   : > { %4823 = vmatpush3.msra.mxu1 %v1753_v11  ;;  %v2974_v11 = vld [vmem:[%s6560_s11 + $0x60] sm:$0xff] }
 0x3ae   : > { %4824 = vmatprep.subr.mxu1 %v1752_v22 }
 0x3af   : > { %4825 = vmatpush3.msra.mxu1 %v1752_v22  ;;  %v2966_v22 = vld [vmem:[%s6560_s11 + $0x20] sm:$0xff] }
 0x3b0   : > { %4826 = vmatprep.subr.mxu1 %v1751_v23 }
 0x3b1   : > { %4827 = vmatpush3.msra.mxu1 %v1751_v23  ;;  %v3874_v23 = vld [vmem:[%s6560_s11 + $0x98] sm:$0xff] }
 0x3b2   : > { %4828 = vmatprep.subr.mxu1 %v1750_v24 }
 0x3b3   : > { %4829 = vmatpush3.msra.mxu1 %v1750_v24  ;;  %v2965_v24 = vld [vmem:[%s6560_s11 + $0x18] sm:$0xff] }
 0x3b4   : > { %4844 = vmatprep.subr.mxu1 %v1761_v25 }
 0x3d4   : > { %v4789_v26 = vpop.f32.mrf.mxu0 }
 0x3d6   : > { %v2272_v27 = vpop.f32.mrf.mxu0 }
 0x3d7   : > { %4819 = vmatprep.mubr.msk.f32.mxu0 %vm1762_vm0, %v2272_v27  ;;  %v3872_v27 = vld [vmem:[%s6560_s11 + $0x88] sm:$0xff] }
 0x3d8   : > { %4820 = vmatmul.mubr.msk.f32.vlgmr.msra.gmra.mxu0 %vm1762_vm0, %v4789_v26  ;;  %v2964_v26 = vld [vmem:[%s6560_s11 + $0x10] sm:$0xff] }
 0x3d9   : > { %4834 = vmatpush3.msra.mxu0 %v1757_v15  ;;  %v3878_v15 = vld [vmem:[%s6560_s11 + $0xb8] sm:$0xff] }
 0x3da   : > { %4835 = vmatprep.subr.mxu0 %v1756_v28 }
 0x3db   : > { %4836 = vmatpush3.msra.mxu0 %v1756_v28  ;;  %v2963_v28 = vld [vmem:[%s6560_s11 + $0x8] sm:$0xff] }
 0x3dc   : > { %4837 = vmatprep.subr.mxu0 %v1755_v29 }
 0x3dd   : > { %4838 = vmatpush3.msra.mxu0 %v1755_v29  ;;  %v3871_v29 = vld [vmem:[%s6560_s11 + $0x80] sm:$0xff] }
 0x3de   : > { %4839 = vmatprep.subr.mxu0 %v1754_v30 }
 0x3df   : > { %4840 = vmatpush3.msra.mxu0 %v1754_v30  ;;  %v2962_v30 = vld [vmem:[%s6560_s11] sm:$0xff] }
 0x3e0   : > { %4855 = vmatprep.subr.mxu0 %v2977_v7 }
 0x40a   : > { %v4796_v31 = vpop.f32.mrf.mxu1 }
 0x40c   : > { %v2353_v34 = vpop.f32.mrf.mxu1 }
 0x40d   : > { %4830 = vmatprep.mubr.msk.f32.mxu1 %vm1762_vm0, %v2353_v34 }
 0x40e   : > { %4831 = vmatmul.mubr.msk.f32.vlgmr.msra.gmra.mxu1 %vm1762_vm0, %v4796_v31  ;;  %v3904_v31 = vld [vmem:[%s6560_s11 + $0x178] sm:$0xff] }
 0x40f   : > { %4845 = vmatpush3.msra.mxu1 %v1761_v25  ;;  %v3873_v25 = vld [vmem:[%s6560_s11 + $0x90] sm:$0xff] }
 0x410   : > { %4846 = vmatprep.subr.mxu1 %v1760_v35 }
 0x411   : > { %4847 = vmatpush3.msra.mxu1 %v1760_v35 }
 0x412   : > { %4848 = vmatprep.subr.mxu1 %v1759_v36 }
 0x413   : > { %4849 = vmatpush3.msra.mxu1 %v1759_v36 }
 0x414   : > { %4850 = vmatprep.subr.mxu1 %v1758_v37 }
 0x415   : > { %4851 = vmatpush3.msra.mxu1 %v1758_v37 }
 0x416   : > { %4890 = vmatprep.subr.mxu1 %v3886_v6 }
 0x42b   : > { %v4803_v38 = vpop.f32.mrf.mxu0 }
 0x42d   : > { %v2434_v39 = vpop.f32.mrf.mxu0 }
 0x42e   : > { %4841 = vmatprep.mubr.msk.f32.mxu0 %vm1762_vm0, %v2434_v39 }
 0x42f   : > { %4842 = vmatmul.mubr.msk.f32.vlgmr.msra.gmra.mxu0 %vm1762_vm0, %v4803_v38 }
 0x430   : > { %4856 = vmatpush3.msra.mxu0 %v2977_v7 }
 0x431   : > { %4857 = vmatprep.subr.mxu0 %v2976_v9 }
 0x432   : > { %4858 = vmatpush3.msra.mxu0 %v2976_v9 }
 0x433   : > { %4859 = vmatprep.subr.mxu0 %v2975_v45 }
 0x434   : > { %4860 = vmatpush3.msra.mxu0 %v2975_v45  ;;  %v3903_v45 = vld [vmem:[%s6560_s11 + $0x170] sm:$0xff] }
 0x435   : > { %4861 = vmatprep.subr.mxu0 %v2974_v11 }
 0x436   : > { %4862 = vmatpush3.msra.mxu0 %v2974_v11  ;;  %v3902_v11 = vld [vmem:[%s6560_s11 + $0x168] sm:$0xff] }
 0x437   : > { %4863 = vmatprep.subr.mxu0 %v2973_v32 }
 0x438   : > { %4864 = vmatpush3.msra.mxu0 %v2973_v32  ;;  %v3900_v32 = vld [vmem:[%s6560_s11 + $0x158] sm:$0xff] }
 0x439   : > { %4865 = vmatprep.subr.mxu0 %v2972_v33 }
 0x43a   : > { %4866 = vmatpush3.msra.mxu0 %v2972_v33  ;;  %v3898_v33 = vld [vmem:[%s6560_s11 + $0x148] sm:$0xff] }
 0x43b   : > { %4867 = vmatprep.subr.mxu0 %v2971_v59 }
 0x43c   : > { %4868 = vmatpush3.msra.mxu0 %v2971_v59  ;;  %v3896_v59 = vld [vmem:[%s6560_s11 + $0x138] sm:$0xff] }
 0x43d   : > { %4869 = vmatprep.subr.mxu0 %v2970_v4 }
 0x43e   : > { %4870 = vmatpush3.msra.mxu0 %v2970_v4  ;;  %v3894_v4 = vld [vmem:[%s6560_s11 + $0x128] sm:$0xff] }
 0x43f   : > { %4871 = vmatprep.subr.mxu0 %v2969_v16 }
 0x440   : > { %4872 = vmatpush3.msra.mxu0 %v2969_v16  ;;  %v3892_v16 = vld [vmem:[%s6560_s11 + $0x118] sm:$0xff] }
 0x441   : > { %4873 = vmatprep.subr.mxu0 %v2968_v18 }
 0x442   : > { %4874 = vmatpush3.msra.mxu0 %v2968_v18  ;;  %v3891_v18 = vld [vmem:[%s6560_s11 + $0x110] sm:$0xff] }
 0x443   : > { %4875 = vmatprep.subr.mxu0 %v2967_v20 }
 0x444   : > { %4876 = vmatpush3.msra.mxu0 %v2967_v20 }
 0x445   : > { %4877 = vmatprep.subr.mxu0 %v2966_v22 }
 0x446   : > { %4878 = vmatpush3.msra.mxu0 %v2966_v22 }
 0x447   : > { %4879 = vmatprep.subr.mxu0 %v2965_v24 }
 0x448   : > { %4880 = vmatpush3.msra.mxu0 %v2965_v24  ;;  %v3923_v24 = vld [vmem:[%s6562_s13 + $0xf8] sm:$0xff] }
 0x449   : > { %4881 = vmatprep.subr.mxu0 %v2964_v26 }
 0x44a   : > { %4882 = vmatpush3.msra.mxu0 %v2964_v26  ;;  %v3922_v26 = vld [vmem:[%s6562_s13 + $0xf0] sm:$0xff] }
 0x44b   : > { %4883 = vmatprep.subr.mxu0 %v2963_v28 }
 0x44c   : > { %4884 = vmatpush3.msra.mxu0 %v2963_v28  ;;  %v3921_v28 = vld [vmem:[%s6562_s13 + $0xe8] sm:$0xff] }
 0x44d   : > { %4885 = vmatprep.subr.mxu0 %v2962_v30 }
 0x44e   : > { %4886 = vmatpush3.msra.mxu0 %v2962_v30  ;;  %v3920_v30 = vld [vmem:[%s6562_s13 + $0xe0] sm:$0xff] }
 0x44f   : > { %4925 = vmatprep.subr.mxu0 %v3904_v31 }
 0x46c   : > { %v4810_v40 = vpop.f32.mrf.mxu1 }
 0x46e   : > { %v2515_v41 = vpop.f32.mrf.mxu1 }
 0x46f   : > { %4852 = vmatprep.mubr.msk.f32.mxu1 %vm1762_vm0, %v2515_v41 }
 0x470   : > { %4853 = vmatmul.mubr.msk.f32.vlgmr.msra.gmra.mxu1 %vm1762_vm0, %v4810_v40 }
 0x471   : > { %4891 = vmatpush3.msra.mxu1 %v3886_v6  ;;  %v3938_v6 = vld [vmem:[%s6562_s13 + $0x160] sm:$0xff] }
 0x472   : > { %4892 = vmatprep.subr.mxu1 %v3885_v8 }
 0x473   : > { %4893 = vmatpush3.msra.mxu1 %v3885_v8 }
 0x474   : > { %4894 = vmatprep.subr.mxu1 %v3884_v10 }
 0x475   : > { %4895 = vmatpush3.msra.mxu1 %v3884_v10 }
 0x476   : > { %4896 = vmatprep.subr.mxu1 %v3883_v47 }
 0x477   : > { %4897 = vmatpush3.msra.mxu1 %v3883_v47 }
 0x478   : > { %4898 = vmatprep.subr.mxu1 %v3882_v12 }
 0x479   : > { %4899 = vmatpush3.msra.mxu1 %v3882_v12  ;;  %v3901_v12 = vld [vmem:[%s6560_s11 + $0x160] sm:$0xff] }
 0x47a   : > { %4900 = vmatprep.subr.mxu1 %v3881_v13 }
 0x47b   : > { %4901 = vmatpush3.msra.mxu1 %v3881_v13  ;;  %v3899_v13 = vld [vmem:[%s6560_s11 + $0x150] sm:$0xff] }
 0x47c   : > { %4902 = vmatprep.subr.mxu1 %v3880_v14 }
 0x47d   : > { %4903 = vmatpush3.msra.mxu1 %v3880_v14  ;;  %v3897_v14 = vld [vmem:[%s6560_s11 + $0x140] sm:$0xff] }
 0x47e   : > { %4904 = vmatprep.subr.mxu1 %v3879_v63 }
 0x47f   : > { %4905 = vmatpush3.msra.mxu1 %v3879_v63  ;;  %v3895_v63 = vld [vmem:[%s6560_s11 + $0x130] sm:$0xff] }
 0x480   : > { %4906 = vmatprep.subr.mxu1 %v3878_v15 }
 0x481   : > { %4907 = vmatpush3.msra.mxu1 %v3878_v15  ;;  %v3893_v15 = vld [vmem:[%s6560_s11 + $0x120] sm:$0xff] }
 0x482   : > { %4908 = vmatprep.subr.mxu1 %v3877_v17 }
 0x483   : > { %4909 = vmatpush3.msra.mxu1 %v3877_v17 }
 0x484   : > { %4910 = vmatprep.subr.mxu1 %v3876_v19 }
 0x485   : > { %4911 = vmatpush3.msra.mxu1 %v3876_v19  ;;  %v3890_v19 = vld [vmem:[%s6560_s11 + $0x108] sm:$0xff] }
 0x486   : > { %4912 = vmatprep.subr.mxu1 %v3875_v21 }
 0x487   : > { %4913 = vmatpush3.msra.mxu1 %v3875_v21  ;;  %v3889_v21 = vld [vmem:[%s6560_s11 + $0x100] sm:$0xff] }
 0x488   : > { %4914 = vmatprep.subr.mxu1 %v3874_v23 }
 0x489   : > { %4915 = vmatpush3.msra.mxu1 %v3874_v23 }
 0x48a   : > { %4916 = vmatprep.subr.mxu1 %v3873_v25 }
 0x48b   : > { %4917 = vmatpush3.msra.mxu1 %v3873_v25  ;;  %v3280_v25 = vld [vmem:[%s6562_s13 + $0x78] sm:$0xff] }
 0x48c   : > { %4918 = vmatprep.subr.mxu1 %v3872_v27 }
 0x48d   : > { %4919 = vmatpush3.msra.mxu1 %v3872_v27  ;;  %v3279_v27 = vld [vmem:[%s6562_s13 + $0x70] sm:$0xff] }
 0x48e   : > { %4920 = vmatprep.subr.mxu1 %v3871_v29 }
 0x48f   : > { %4921 = vmatpush3.msra.mxu1 %v3871_v29  ;;  %v3278_v29 = vld [vmem:[%s6562_s13 + $0x68] sm:$0xff] }
 0x490   : > { %4960 = vmatprep.subr.mxu1 %v3280_v25 }
 0x498   : > { %v4821_v42 = vpop.f32.mrf.mxu0 }
 0x49a   : > { %v2596_v43 = vpop.f32.mrf.mxu0 }
 0x4ce   : > { %v4832_v44 = vpop.f32.mrf.mxu1 }
 0x4cf   : > { %v2851_v49 = vadd.f32 %v4832_v44, %v4821_v42 }
 0x4d0   : > { %v2677_v48 = vpop.f32.mrf.mxu1 }
 0x4d1   : > { %v2848_v51 = vadd.f32 %v2677_v48, %v2596_v43 }
 0x4ef   : > { %v4843_v46 = vpop.f32.mrf.mxu0 }
 0x4f0   : > { %v2852_v52 = vadd.f32 %v4843_v46, %v2851_v49 }
 0x4f1   : > { %v2758_v50 = vpop.f32.mrf.mxu0 }
 0x4f2   : > { %v2849_v55 = vadd.f32 %v2848_v51, %v2758_v50  ;;  %v2928_v50 = vlaneseq }
 0x530   : > { %v4854_v53 = vpop.f32.mrf.mxu1 }
 0x531   : > { %v2853_v56 = vadd.f32 %v4854_v53, %v2852_v52  ;;  %v3869_v53 = vld [vmem:[%s6558_s9] ss:$0 sm:$0xff] }
 0x532   : > { %v2839_v57 = vpop.f32.mrf.mxu1 }
 0x533   : > { %v2862_v58 = vadd.f32 %v3868_v54, %v2853_v56  ;;  %v2850_v60 = vadd.f32 %v2849_v55, %v2839_v57  ;;  %v6241_v56 = vshrl.u32 %v2928_v50, 7  ;;  %v3912_v50 = vld [vmem:[%s6562_s13 + $0xa0] sm:$0xff] }
 0x535   : > { %v2861_v61 = vadd.f32 %v3868_v54, %v2850_v60  ;;  %v6126_v0 = vadd.f32 %v5146_v62, %v2862_v58  ;;  %v3870_v58 = vld [vmem:[%s6559_s10] ss:$0 sm:$0xff]  ;;  %vm2930_vm2 = vcmp.lt.s32.totalorder %v6241_v56, 1  ;;  %vm3130_vm4 = vcmp.lt.s32.totalorder %v6241_v56, 7 }
 0x536   : > { %v2933_v17 = vadd.s32 8, %v6241_v56 }
 0x537   : > { %2869 = vadd.xlane.f32.xlu1 %v6126_v0  ;;  %v6130_v2 = vadd.f32 %v5147_v1, %v2861_v61  ;;  %v2872_v3 = vmul.f32 %v6126_v0, %v6126_v0 }
 0x538   : > { %v2945_v20 = vand.u32 15, %v2933_v17 }
 0x539   : > { %2867 = vadd.xlane.f32.xlu0 %v6130_v2  ;;  %v2871_v5 = vmul.f32 %v6130_v2, %v6130_v2 }
 0x53a   : > { %vm6317_vm5 = vcmp.ne.s32.totalorder %v2945_v20, 15  ;;  %v3939_v20 = vld [vmem:[%s6562_s13 + $0x168] sm:$0xff] }
 0x53b   : > { %2875 = vadd.xlane.f32.xlu1 %v2872_v3 }
 0x53d   : > { %2873 = vadd.xlane.f32.xlu0 %v2871_v5 }
 0x5c0   : > { %v2870_v34 = vpop.xlane.xlu1 %2869 }
 0x5c1   : > { %v2878_v35 = vmul.f32 0.0078125, %v2870_v34  ;;  %v3919_v34 = vld [vmem:[%s6562_s13 + $0xd8] sm:$0xff] }
 0x5c2   : > { %v2868_v36 = vpop.xlane.xlu0 %2867 }
 0x5c3   : > { %v2877_v37 = vmul.f32 0.0078125, %v2868_v36  ;;  %v2882_v39 = vmul.f32 %v2878_v35, %v2878_v35  ;;  %v2886_v51 = vsub.f32 %v6126_v0, %v2878_v35  ;;  %v2938_v0 = vand.u32 15, %v6241_v56  ;;  %v3276_v35 = vld [vmem:[%s6562_s13 + $0x58] sm:$0xff]  ;;  %v3918_v36 = vld [vmem:[%s6562_s13 + $0xd0] sm:$0xff] }
 0x5c4   : > { %v2876_v38 = vpop.xlane.xlu1 %2875 }
 0x5c5   : > { %v2880_v40 = vmul.f32 0.0078125, %v2876_v38  ;;  %v2881_v42 = vmul.f32 %v2877_v37, %v2877_v37  ;;  %v2885_v54 = vsub.f32 %v6130_v2, %v2877_v37  ;;  %vm6255_vm3 = vcmp.ne.s32.totalorder %v2938_v0, 0  ;;  %v3275_v37 = vld [vmem:[%s6562_s13 + $0x50] sm:$0xff]  ;;  %v3917_v38 = vld [vmem:[%s6562_s13 + $0xc8] sm:$0xff] }
 0x5c6   : > { %v2874_v41 = vpop.xlane.xlu0 %2873 }
 0x5c7   : > { %v2884_v43 = vsub.f32 %v2880_v40, %v2882_v39  ;;  %v2879_v44 = vmul.f32 0.0078125, %v2874_v41  ;;  %v3274_v39 = vld [vmem:[%s6562_s13 + $0x48] sm:$0xff]  ;;  %v3916_v40 = vld [vmem:[%s6562_s13 + $0xc0] sm:$0xff] }
 0x5c8   : > { %v3273_v41 = vld [vmem:[%s6562_s13 + $0x40] sm:$0xff] }
 0x5c9   : > { %v2888_v46 = vadd.f32 1e-05, %v2884_v43  ;;  %v2883_v48 = vsub.f32 %v2879_v44, %v2881_v42  ;;  %v3915_v42 = vld [vmem:[%s6562_s13 + $0xb8] sm:$0xff]  ;;  %v3914_v44 = vld [vmem:[%s6562_s13 + $0xb0] sm:$0xff] }
 0x5ca   : > { %v3272_v43 = vld [vmem:[%s6562_s13 + $0x38] sm:$0xff] }
 0x5cb   : > { %5138 = vrsqrt.f32 %v2888_v46  ;;  %v2887_v49 = vadd.f32 1e-05, %v2883_v48  ;;  %v3271_v46 = vld [vmem:[%s6562_s13 + $0x30] sm:$0xff]  ;;  %v3913_v48 = vld [vmem:[%s6562_s13 + $0xa8] sm:$0xff] }
 0x5cd   : > { %5140 = vrsqrt.f32 %v2887_v49  ;;  %v3270_v49 = vld [vmem:[%s6562_s13 + $0x28] sm:$0xff] }
 0x5d8   : > { %v5139_v52 = vpop.eup %5138 }
 0x5d9   : > { %v2892_v55 = vmul.f32 %v5139_v52, %v2886_v51  ;;  %v3269_v51 = vld [vmem:[%s6562_s13 + $0x20] sm:$0xff]  ;;  %v3911_v52 = vld [vmem:[%s6562_s13 + $0x98] sm:$0xff] }
 0x5da   : > { %v5141_v57 = vpop.eup %5140 }
 0x5db   : > { %v2891_v60 = vmul.f32 %v5141_v57, %v2885_v54  ;;  %v2900_v61 = vmul.f32 %v3869_v53, %v2892_v55  ;;  %v3910_v54 = vld [vmem:[%s6562_s13 + $0x90] sm:$0xff]  ;;  %v3909_v57 = vld [vmem:[%s6562_s13 + $0x88] sm:$0xff] }
 0x5dc   : > { %v3267_v55 = vld [vmem:[%s6562_s13 + $0x10] sm:$0xff] }
 0x5dd   : > { %v2899_v62 = vmul.f32 %v3869_v53, %v2891_v60  ;;  %v6246_v1 = vadd.f32 %v3870_v58, %v2900_v61  ;;  %v3268_v53 = vld [vmem:[%s6562_s13 + $0x18] sm:$0xff]  ;;  %v3908_v60 = vld [vmem:[%s6562_s13 + $0x80] sm:$0xff] }
 0x5de   : > { %v3265_v61 = vld [vmem:[%s6562_s13] sm:$0xff] }
 0x5df   : > { %v6249_v3 = vadd.f32 %v3870_v58, %v2899_v62  ;;  %v2927_v5 = vrot.slane %v6246_v1, 7  ;;  %v3129_v10 = vrot.slane %v6246_v1, 1  ;;  %v3266_v58 = vld [vmem:[%s6562_s13 + $0x8] sm:$0xff]  ;;  %v3941_v62 = vld [vmem:[%s6562_s13 + $0x178] sm:$0xff] }
 0x5e1   : > { %4922 = vmatprep.mubr.f32.mxu1 %v6249_v3  ;;  %v2926_v2 = vrot.slane %v6249_v3, 7  ;;  %v3128_v7 = vrot.slane %v6249_v3, 1 }
 0x5e2   : > { %4923 = vmatmul.mubr.f32.vlgmr.msra.gmra.mxu1 %v6246_v1 }
 0x5e3   : > { %v2932_v8 = vsel %vm2930_vm2, %v2927_v5, %v2926_v2  ;;  %v2931_v9 = vsel %vm2930_vm2, %v2926_v2, %v2927_v5  ;;  %v3131_v47 = vsel %vm3130_vm4, %v3128_v7, %v3129_v10  ;;  %v3132_v23 = vsel %vm3130_vm4, %v3129_v10, %v3128_v7  ;;  %4961 = vmatpush3.msra.mxu1 %v3280_v25  ;;  %v3907_v10 = vld [vmem:[%s6561_s12] ss:$0 sm:$0xff] }
 0x5e4   : > { %4887 = vmatprep.mubr.msk.f32.mxu0 %vm6255_vm3, %v2932_v8  ;;  %4962 = vmatprep.subr.mxu1 %v3279_v27  ;;  %v3934_v25 = vld [vmem:[%s6562_s13 + $0x140] sm:$0xff] }
 0x5e5   : > { %4888 = vmatmul.mubr.f32.vlgmr.msra.gmra.mxu0 %v2931_v9  ;;  %4963 = vmatpush3.msra.mxu1 %v3279_v27  ;;  %v3932_v27 = vld [vmem:[%s6562_s13 + $0x130] sm:$0xff] }
 0x5e6   : > { %4926 = vmatpush3.msra.mxu0 %v3904_v31  ;;  %4957 = vmatprep.mubr.f32.mxu0 %v3131_v47  ;;  %v3277_v31 = vld [vmem:[%s6562_s13 + $0x60] sm:$0xff] }
 0x5e7   : > { %4927 = vmatprep.subr.mxu0 %v3903_v45  ;;  %4964 = vmatprep.subr.mxu1 %v3278_v29 }
 0x5e8   : > { %4928 = vmatpush3.msra.mxu0 %v3903_v45  ;;  %4965 = vmatpush3.msra.mxu1 %v3278_v29  ;;  %v3930_v29 = vld [vmem:[%s6562_s13 + $0x120] sm:$0xff] }
 0x5e9   : > { %4929 = vmatprep.subr.mxu0 %v3902_v11  ;;  %4966 = vmatprep.subr.mxu1 %v3277_v31 }
 0x5ea   : > { %4930 = vmatpush3.msra.mxu0 %v3902_v11  ;;  %4967 = vmatpush3.msra.mxu1 %v3277_v31  ;;  %v3928_v31 = vld [vmem:[%s6562_s13 + $0x110] sm:$0xff] }
 0x5eb   : > { %4931 = vmatprep.subr.mxu0 %v3901_v12  ;;  %4968 = vmatprep.subr.mxu1 %v3276_v35 }
 0x5ec   : > { %4932 = vmatpush3.msra.mxu0 %v3901_v12  ;;  %4969 = vmatpush3.msra.mxu1 %v3276_v35  ;;  %v3926_v35 = vld [vmem:[%s6562_s13 + $0x100] sm:$0xff] }
 0x5ed   : > { %4933 = vmatprep.subr.mxu0 %v3900_v32  ;;  %4970 = vmatprep.subr.mxu1 %v3275_v37 }
 0x5ee   : > { %4934 = vmatpush3.msra.mxu0 %v3900_v32  ;;  %4971 = vmatpush3.msra.mxu1 %v3275_v37 }
 0x5ef   : > { %4935 = vmatprep.subr.mxu0 %v3899_v13  ;;  %4972 = vmatprep.subr.mxu1 %v3274_v39 }
 0x5f0   : > { %4936 = vmatpush3.msra.mxu0 %v3899_v13  ;;  %4973 = vmatpush3.msra.mxu1 %v3274_v39 }
 0x5f1   : > { %4937 = vmatprep.subr.mxu0 %v3898_v33  ;;  %4974 = vmatprep.subr.mxu1 %v3273_v41 }
 0x5f2   : > { %4938 = vmatpush3.msra.mxu0 %v3898_v33  ;;  %4975 = vmatpush3.msra.mxu1 %v3273_v41 }
 0x5f3   : > { %4939 = vmatprep.subr.mxu0 %v3897_v14  ;;  %4976 = vmatprep.subr.mxu1 %v3272_v43 }
 0x5f4   : > { %4940 = vmatpush3.msra.mxu0 %v3897_v14  ;;  %4977 = vmatpush3.msra.mxu1 %v3272_v43  ;;  %v3944_v43 = vld [vmem:[%s6563_s14] ss:$0 sm:$0xff] }
 0x5f5   : > { %4941 = vmatprep.subr.mxu0 %v3896_v59  ;;  %4978 = vmatprep.subr.mxu1 %v3271_v46 }
 0x5f6   : > { %4942 = vmatpush3.msra.mxu0 %v3896_v59  ;;  %4979 = vmatpush3.msra.mxu1 %v3271_v46 }
 0x5f7   : > { %4943 = vmatprep.subr.mxu0 %v3895_v63  ;;  %4980 = vmatprep.subr.mxu1 %v3270_v49 }
 0x5f8   : > { %4944 = vmatpush3.msra.mxu0 %v3895_v63  ;;  %4981 = vmatpush3.msra.mxu1 %v3270_v49 }
 0x5f9   : > { %4945 = vmatprep.subr.mxu0 %v3894_v4  ;;  %4982 = vmatprep.subr.mxu1 %v3269_v51 }
 0x5fa   : > { %4946 = vmatpush3.msra.mxu0 %v3894_v4  ;;  %4983 = vmatpush3.msra.mxu1 %v3269_v51 }
 0x5fb   : > { %4947 = vmatprep.subr.mxu0 %v3893_v15  ;;  %4984 = vmatprep.subr.mxu1 %v3268_v53 }
 0x5fc   : > { %4948 = vmatpush3.msra.mxu0 %v3893_v15  ;;  %4985 = vmatpush3.msra.mxu1 %v3268_v53 }
 0x5fd   : > { %4949 = vmatprep.subr.mxu0 %v3892_v16  ;;  %4986 = vmatprep.subr.mxu1 %v3267_v55 }
 0x5fe   : > { %4950 = vmatpush3.msra.mxu0 %v3892_v16  ;;  %4987 = vmatpush3.msra.mxu1 %v3267_v55 }
 0x5ff   : > { %4951 = vmatprep.subr.mxu0 %v3891_v18  ;;  %4988 = vmatprep.subr.mxu1 %v3266_v58 }
 0x600   : > { %4952 = vmatpush3.msra.mxu0 %v3891_v18  ;;  %4989 = vmatpush3.msra.mxu1 %v3266_v58  ;;  %v3940_v18 = vld [vmem:[%s6562_s13 + $0x170] sm:$0xff] }
 0x601   : > { %4953 = vmatprep.subr.mxu0 %v3890_v19  ;;  %4990 = vmatprep.subr.mxu1 %v3265_v61 }
 0x602   : > { %4954 = vmatpush3.msra.mxu0 %v3890_v19  ;;  %4991 = vmatpush3.msra.mxu1 %v3265_v61 }
 0x603   : > { %4955 = vmatprep.subr.mxu0 %v3889_v21  ;;  %5030 = vmatprep.subr.mxu1 %v3941_v62 }
 0x604   : > { %4956 = vmatpush3.msra.mxu0 %v3889_v21  ;;  %v3937_v21 = vld [vmem:[%s6562_s13 + $0x158] sm:$0xff] }
 0x605   : > { %4958 = vmatmul.mubr.msk.f32.vlgmr.msra.gmra.mxu0 %vm6317_vm5, %v3132_v23  ;;  %4995 = vmatprep.subr.mxu0 %v3923_v24  ;;  %v3936_v23 = vld [vmem:[%s6562_s13 + $0x150] sm:$0xff] }
 0x606   : > { %4996 = vmatpush3.msra.mxu0 %v3923_v24  ;;  %v3935_v24 = vld [vmem:[%s6562_s13 + $0x148] sm:$0xff] }
 0x607   : > { %4997 = vmatprep.subr.mxu0 %v3922_v26 }
 0x608   : > { %4998 = vmatpush3.msra.mxu0 %v3922_v26  ;;  %v3933_v26 = vld [vmem:[%s6562_s13 + $0x138] sm:$0xff] }
 0x609   : > { %4999 = vmatprep.subr.mxu0 %v3921_v28 }
 0x60a   : > { %5000 = vmatpush3.msra.mxu0 %v3921_v28  ;;  %v3931_v28 = vld [vmem:[%s6562_s13 + $0x128] sm:$0xff] }
 0x60b   : > { %5001 = vmatprep.subr.mxu0 %v3920_v30 }
 0x60c   : > { %5002 = vmatpush3.msra.mxu0 %v3920_v30  ;;  %v3929_v30 = vld [vmem:[%s6562_s13 + $0x118] sm:$0xff] }
 0x60d   : > { %5003 = vmatprep.subr.mxu0 %v3919_v34 }
 0x60e   : > { %5004 = vmatpush3.msra.mxu0 %v3919_v34  ;;  %v3927_v34 = vld [vmem:[%s6562_s13 + $0x108] sm:$0xff] }
 0x60f   : > { %5005 = vmatprep.subr.mxu0 %v3918_v36 }
 0x610   : > { %5006 = vmatpush3.msra.mxu0 %v3918_v36 }
 0x611   : > { %5007 = vmatprep.subr.mxu0 %v3917_v38 }
 0x612   : > { %5008 = vmatpush3.msra.mxu0 %v3917_v38 }
 0x613   : > { %5009 = vmatprep.subr.mxu0 %v3916_v40 }
 0x614   : > { %5010 = vmatpush3.msra.mxu0 %v3916_v40 }
 0x615   : > { %5011 = vmatprep.subr.mxu0 %v3915_v42 }
 0x616   : > { %5012 = vmatpush3.msra.mxu0 %v3915_v42 }
 0x617   : > { %5013 = vmatprep.subr.mxu0 %v3914_v44 }
 0x618   : > { %5014 = vmatpush3.msra.mxu0 %v3914_v44 }
 0x619   : > { %5015 = vmatprep.subr.mxu0 %v3913_v48 }
 0x61a   : > { %5016 = vmatpush3.msra.mxu0 %v3913_v48 }
 0x61b   : > { %5017 = vmatprep.subr.mxu0 %v3912_v50 }
 0x61c   : > { %5018 = vmatpush3.msra.mxu0 %v3912_v50 }
 0x61d   : > { %5019 = vmatprep.subr.mxu0 %v3911_v52 }
 0x61e   : > { %5020 = vmatpush3.msra.mxu0 %v3911_v52 }
 0x61f   : > { %5021 = vmatprep.subr.mxu0 %v3910_v54 }
 0x620   : > { %5022 = vmatpush3.msra.mxu0 %v3910_v54 }
 0x621   : > { %5023 = vmatprep.subr.mxu0 %v3909_v57 }
 0x622   : > { %5024 = vmatpush3.msra.mxu0 %v3909_v57 }
 0x623   : > { %5025 = vmatprep.subr.mxu0 %v3908_v60 }
 0x624   : > { %5026 = vmatpush3.msra.mxu0 %v3908_v60 }
 0x6a2   : > { %v4924_v2 = vpop.f32.mrf.mxu1 }
 0x6a4   : > { %v3119_v8 = vpop.f32.mrf.mxu1 }
 0x6a5   : > { %v4889_v0 = vpop.f32.mrf.mxu0 }
 0x6a6   : > { %v3125_v7 = vadd.f32 %v4924_v2, %v4889_v0 }
 0x6a7   : > { %v3044_v5 = vpop.f32.mrf.mxu0 }
 0x6a8   : > { %v3120_v45 = vadd.f32 %v3119_v8, %v3044_v5 }
 0x6c5   : > { %v4959_v9 = vpop.f32.mrf.mxu0 }
 0x6c6   : > { %v3230_v47 = vadd.f32 %v4959_v9, %v3125_v7 }
 0x6c7   : > { %v3220_v11 = vpop.f32.mrf.mxu0 }
 0x6c8   : > { %v3239_v12 = vadd.f32 %v3907_v10, %v3230_v47  ;;  %v3229_v32 = vadd.f32 %v3220_v11, %v3120_v45  ;;  %v3945_v45 = vld [vmem:[%s6564_s15] ss:$0 sm:$0xff] }
 0x6ca   : > { %v6427_v13 = vmax.f32 %v3239_v12, 0.0  ;;  %v3238_v33 = vadd.f32 %v3907_v10, %v3229_v32  ;;  %v3946_v32 = vld [vmem:[%s6565_s16] ss:$0 sm:$0xff] }
 0x6cc   : > { %v3240_v14 = vmax.f32 %v3238_v33, 0.0  ;;  %v3260_v59 = vrot.slane %v6427_v13, 7  ;;  %v3432_v17 = vrot.slane %v6427_v13, 1 }
 0x6ce   : > { %v3259_v63 = vrot.slane %v3240_v14, 7  ;;  %5027 = vmatprep.mubr.f32.mxu0 %v3240_v14  ;;  %v3431_v4 = vrot.slane %v3240_v14, 1 }
 0x6cf   : > { %5028 = vmatmul.mubr.f32.vlgmr.msra.gmra.mxu0 %v6427_v13 }
 0x6d0   : > { %v3262_v15 = vsel %vm2930_vm2, %v3260_v59, %v3259_v63  ;;  %v3261_v16 = vsel %vm2930_vm2, %v3259_v63, %v3260_v59  ;;  %v3433_v19 = vsel %vm3130_vm4, %v3431_v4, %v3432_v17  ;;  %v3434_v36 = vsel %vm3130_vm4, %v3432_v17, %v3431_v4 }
 0x6d1   : > { %4992 = vmatprep.mubr.msk.f32.mxu1 %vm6255_vm3, %v3262_v15 }
 0x6d2   : > { %4993 = vmatmul.mubr.f32.vlgmr.msra.gmra.mxu1 %v3261_v16 }
 0x6d3   : > { %5031 = vmatpush3.msra.mxu1 %v3941_v62  ;;  %5062 = vmatprep.mubr.f32.mxu1 %v3433_v19 }
 0x6d4   : > { %5032 = vmatprep.subr.mxu1 %v3940_v18 }
 0x6d5   : > { %5033 = vmatpush3.msra.mxu1 %v3940_v18 }
 0x6d6   : > { %5034 = vmatprep.subr.mxu1 %v3939_v20 }
 0x6d7   : > { %5035 = vmatpush3.msra.mxu1 %v3939_v20 }
 0x6d8   : > { %5036 = vmatprep.subr.mxu1 %v3938_v6 }
 0x6d9   : > { %5037 = vmatpush3.msra.mxu1 %v3938_v6 }
 0x6da   : > { %5038 = vmatprep.subr.mxu1 %v3937_v21 }
 0x6db   : > { %5039 = vmatpush3.msra.mxu1 %v3937_v21 }
 0x6dc   : > { %5040 = vmatprep.subr.mxu1 %v3936_v23 }
 0x6dd   : > { %5041 = vmatpush3.msra.mxu1 %v3936_v23 }
 0x6de   : > { %5042 = vmatprep.subr.mxu1 %v3935_v24 }
 0x6df   : > { %5043 = vmatpush3.msra.mxu1 %v3935_v24 }
 0x6e0   : > { %5044 = vmatprep.subr.mxu1 %v3934_v25 }
 0x6e1   : > { %5045 = vmatpush3.msra.mxu1 %v3934_v25 }
 0x6e2   : > { %5046 = vmatprep.subr.mxu1 %v3933_v26 }
 0x6e3   : > { %5047 = vmatpush3.msra.mxu1 %v3933_v26 }
 0x6e4   : > { %5048 = vmatprep.subr.mxu1 %v3932_v27 }
 0x6e5   : > { %5049 = vmatpush3.msra.mxu1 %v3932_v27 }
 0x6e6   : > { %5050 = vmatprep.subr.mxu1 %v3931_v28 }
 0x6e7   : > { %5051 = vmatpush3.msra.mxu1 %v3931_v28 }
 0x6e8   : > { %5052 = vmatprep.subr.mxu1 %v3930_v29 }
 0x6e9   : > { %5053 = vmatpush3.msra.mxu1 %v3930_v29 }
 0x6ea   : > { %5054 = vmatprep.subr.mxu1 %v3929_v30 }
 0x6eb   : > { %5055 = vmatpush3.msra.mxu1 %v3929_v30 }
 0x6ec   : > { %5056 = vmatprep.subr.mxu1 %v3928_v31 }
 0x6ed   : > { %5057 = vmatpush3.msra.mxu1 %v3928_v31 }
 0x6ee   : > { %5058 = vmatprep.subr.mxu1 %v3927_v34 }
 0x6ef   : > { %5059 = vmatpush3.msra.mxu1 %v3927_v34 }
 0x6f0   : > { %5060 = vmatprep.subr.mxu1 %v3926_v35 }
 0x6f1   : > { %5061 = vmatpush3.msra.mxu1 %v3926_v35 }
 0x6f2   : > { %5063 = vmatmul.mubr.msk.f32.vlgmr.msra.gmra.mxu1 %vm6317_vm5, %v3434_v36 }
 0x78f   : > { %v5029_v38 = vpop.f32.mrf.mxu0 }
 0x791   : > { %v3422_v41 = vpop.f32.mrf.mxu0 }
 0x792   : > { %v4994_v37 = vpop.f32.mrf.mxu1 }
 0x793   : > { %v3428_v40 = vadd.f32 %v5029_v38, %v4994_v37 }
 0x794   : > { %v3347_v39 = vpop.f32.mrf.mxu1 }
 0x795   : > { %v3423_v44 = vadd.f32 %v3422_v41, %v3347_v39 }
 0x7b2   : > { %v5064_v42 = vpop.f32.mrf.mxu1 }
 0x7b3   : > { %v3530_v46 = vadd.f32 %v5064_v42, %v3428_v40 }
 0x7b4   : > { %v3520_v48 = vpop.f32.mrf.mxu1 }
 0x7b5   : > { %v3539_v49 = vadd.f32 %v3944_v43, %v3530_v46  ;;  %v3529_v50 = vadd.f32 %v3520_v48, %v3423_v44 }
 0x7b7   : > { %v3538_v56 = vadd.f32 %v3944_v43, %v3529_v50  ;;  %v3541_v51 = vadd.f32 %v3539_v49, %v6246_v1 }
 0x7b9   : > { %3546 = vadd.xlane.f32.xlu1 %v3541_v51  ;;  %v3540_v22 = vadd.f32 %v3538_v56, %v6249_v3  ;;  %v3549_v52 = vmul.f32 %v3541_v51, %v3541_v51 }
 0x7bb   : > { %3544 = vadd.xlane.f32.xlu0 %v3540_v22  ;;  %v3548_v53 = vmul.f32 %v3540_v22, %v3540_v22 }
 0x7bd   : > { %3552 = vadd.xlane.f32.xlu1 %v3549_v52 }
 0x7bf   : > { %3550 = vadd.xlane.f32.xlu0 %v3548_v53 }
 0x842   : > { %v3547_v54 = vpop.xlane.xlu1 %3546 }
 0x843   : > { %v3555_v55 = vmul.f32 0.0078125, %v3547_v54 }
 0x844   : > { %v3545_v57 = vpop.xlane.xlu0 %3544 }
 0x845   : > { %v3554_v58 = vmul.f32 0.0078125, %v3545_v57  ;;  %v3559_v61 = vmul.f32 %v3555_v55, %v3555_v55  ;;  %v3563_v9 = vsub.f32 %v3541_v51, %v3555_v55 }
 0x846   : > { %v3553_v60 = vpop.xlane.xlu1 %3552 }
 0x847   : > { %v3557_v62 = vmul.f32 0.0078125, %v3553_v60  ;;  %v3558_v2 = vmul.f32 %v3554_v58, %v3554_v58  ;;  %v3562_v47 = vsub.f32 %v3540_v22, %v3554_v58 }
 0x848   : > { %v3551_v0 = vpop.xlane.xlu0 %3550 }
 0x849   : > { %v3561_v5 = vsub.f32 %v3557_v62, %v3559_v61  ;;  %v3556_v1 = vmul.f32 0.0078125, %v3551_v0 }
 0x84b   : > { %v3565_v7 = vadd.f32 1e-05, %v3561_v5  ;;  %v3560_v3 = vsub.f32 %v3556_v1, %v3558_v2 }
 0x84d   : > { %5142 = vrsqrt.f32 %v3565_v7  ;;  %v3564_v8 = vadd.f32 1e-05, %v3560_v3 }
 0x84f   : > { %5144 = vrsqrt.f32 %v3564_v8 }
 0x85a   : > { %v5143_v10 = vpop.eup %5142 }
 0x85b   : > { %v3569_v11 = vmul.f32 %v5143_v10, %v3563_v9 }
 0x85c   : > { %v5145_v12 = vpop.eup %5144 }
 0x85d   : > { %v3568_v13 = vmul.f32 %v5145_v12, %v3562_v47  ;;  %v3577_v33 = vmul.f32 %v3945_v45, %v3569_v11 }
 0x85f   : > { %v3576_v14 = vmul.f32 %v3945_v45, %v3568_v13  ;;  %v3585_v59 = vadd.f32 %v3946_v32, %v3577_v33 }
 0x861   : > { %v3584_v63 = vadd.f32 %v3946_v32, %v3576_v14  ;;  %3587 = vst [vmem:[%s542_s29 + $0x8] sm:$0xff] %v3585_v59 }
 0x863   : > { %3586 = vst [vmem:[%s542_s29] sm:$0xff] %v3584_v63 }
 0x864   : > { %5161 = shalt.err (!%p5158_p3)
}
 0x865   : > { %s5162_s27 = scalar_lea.hbm %s6505_s0, 256  ;;  %s5166_s21 = scalar_lea.hbm %s6566_s17, 512 }
 0x866   : > { %p5163_p4 = scmp.ne.s32.totalorder %s6505_s0, %s5162_s27  ;;  %p5167_p9 = scmp.lt.s32.totalorder %s6505_s0, %s6566_s17 }
 0x867   : > { %p5168_p10 = scmp.lt.s32.totalorder %s5166_s21, %s5162_s27 }
 0x868   : > { %p5164_p7 = pnand %p5163_p4, %p5341_p5 }
 0x869   : > { %p5169_p11 = por %p5168_p10, %p5167_p9 }
 0x86a   : > { %p5165_p8 = pneg %p5164_p7 }
 0x86c   : > { %p5170_p12 = pnand %p5169_p11, %p5165_p8 }
 0x86e   : > { %5173 = shalt.err (!%p5170_p12)
}
 0x86f   : > { %s5211_s28 = smov 128   ;;  %s5212_s19 = smov 8  }
 0x870   : > { %5065 = dma.vmem_to_hbm [thread:$0]  (%p5341_p5), %s6507_s30, 256, %s6505_s0, %s6509_s18, %s5211_s28, %s5211_s28, %s5212_s19  }
 0x871 PF: > { %s6592_s26 = sld [smem:[#allocation7_spill]] }
 0x872   : > { %s6593_s24 = sld [smem:[#allocation5_spill]] }
 0x877   : > { %p5071_p13 = scmp.ge.s32.totalorder %s6592_s26, 2 }
 0x878   : > { %s3617_s2 = sand.u32 1, %s6593_s24  }
 0x879   : > { %p5068_p0 = pnand %p5071_p13, %p5345_p6  ;;  %s3618_s27 = scalar_lea.sflag [#allocation3], %s3617_s2 }
 0x87b   : > { %p5069_p1 = pneg %p5068_p0 }
 0x87d   : > { %5191 = dma.done.wait (%p5069_p1), %s3618_s27, 256  }
 0x87e   : > { %5193 = vsyncadd (%p5069_p1), %s3618_s27, 4294967040  ;;  %s6595_s27 = sld [smem:[#allocation8_spill]]  ;;  %s6598_s24 = smov %s5200_s25 }
 0x87f   : > { %s6596_s21 = sld [smem:[#allocation6_spill]] }
 0x880   : > { %s6597_s26 = sld [smem:[#allocation9_spill]] }
 0x884   : > { %p27_p2 = scmp.ge.s32.totalorder %s6595_s27, 4  }
 0x885   : > { %s6599_s25 = smov %s6596_s21 }
 0x886   :  { %29 = sbr.rel (!%p27_p2) target bundleno = 7 (0x7), region = 145 }
 0x88b   :  { %3623 = vsyncpa [#allocation3], 1 }
 0x88c   :  { %3625 = vsyncpa [#allocation3 + $0x1], 1 }

</bundles_post_ra>
